<compile_context>
chip_gen: v7x
topology: tpu7x:2x2x1
jax: 0.10.0
libtpu: 0.0.40
codegen_flags: <defaults>
</compile_context>

<pallas_src>
import functools
import numpy as np
import jax
import jax.numpy as jnp
from jax.experimental import pallas as pl
from jax.experimental.pallas import tpu as pltpu


# ----------------------------------------------------------------------------
# Fused Bottleneck kernel (one M-block per grid step, weights resident)
# ----------------------------------------------------------------------------
def _bottleneck_kernel(xp_ref, w1_ref, b1_ref, w2_ref, b2_ref, w3_ref, b3_ref,
                       wup_ref, bup_ref, o_ref, y1p_ref):
    # xp_ref : (bm, 9*Cin)     bf16  -- tap-major packed input rows
    # w1_ref : (Cin, Cmid)     bf16  -- conv1 (1x1), bn1 scale folded
    # w2_ref : (9*Cmid, Cmid)  bf16  -- conv2 (3x3) tap-packed, bn2 scale folded
    # w3_ref : (Cmid, Cout)    bf16  -- conv3 (1x1), bn3 scale folded
    # wup_ref: (9*Cin, Cout)   bf16  -- shortcut conv (3x3) tap-packed, bn scale folded
    # b*_ref : (1, C)          f32   -- bn shifts
    # y1p_ref: (bm, 9*Cmid)    f32   -- scratch: tap-packed relu(conv1(x))
    bm = xp_ref.shape[0]
    cin = w1_ref.shape[0]
    cmid = w1_ref.shape[1]

    xp = xp_ref[...]                                           # (bm, 9*Cin) bf16
    w1 = w1_ref[...]
    b1 = jnp.broadcast_to(b1_ref[...], (bm, cmid))             # hoisted (single broadcast)

    # conv1 (1x1) + bn1 + relu per tap, written tap-packed into VMEM scratch.
    for t in range(9):
        xt = xp[:, t * cin:(t + 1) * cin]                      # static lane sub-slice
        y1t = jnp.dot(xt, w1, preferred_element_type=jnp.float32) + b1
        y1p_ref[:, t * cmid:(t + 1) * cmid] = jnp.maximum(y1t, 0.0)

    y1p = y1p_ref[...].astype(jnp.bfloat16)                    # (bm, 9*Cmid)

    # conv2 (3x3, stride) + bn2 + relu : one K=9*Cmid matmul.
    y2 = jnp.dot(y1p, w2_ref[...], preferred_element_type=jnp.float32) + b2_ref[...]
    y2 = jnp.maximum(y2, 0.0).astype(jnp.bfloat16)             # (bm, Cmid)

    # conv3 (1x1) + bn3.
    y3 = jnp.dot(y2, w3_ref[...], preferred_element_type=jnp.float32) + b3_ref[...]

    # downsample shortcut: conv(3x3, stride) + bn : one K=9*Cin matmul.
    res = jnp.dot(xp, wup_ref[...], preferred_element_type=jnp.float32) + bup_ref[...]

    # residual add + final relu.
    o_ref[...] = jnp.maximum(y3 + res, 0.0).astype(o_ref.dtype)


# ----------------------------------------------------------------------------
# Wrapper: BN folding, tap packing, pallas_call
# ----------------------------------------------------------------------------
def _fold_bn(w_mat, bn, active, eps):
    """Fold eval-mode BN into a per-output-channel scale on w and a shift vector."""
    if not active:   # AdaptiveBatchNorm2d identity case (spatial height == 1)
        return w_mat, jnp.zeros((1, w_mat.shape[-1]), jnp.float32)
    scale = bn["gamma"] * jax.lax.rsqrt(bn["var"] + eps)
    shift = bn["beta"] - bn["mean"] * scale
    return w_mat * scale, shift.reshape(1, -1)


def bottleneck_forward(params, x, *, stride, eps=1e-5, block_m=128):
    B, Cin, H, W = x.shape
    Cmid = params["w1"].shape[0]
    Cout = params["w3"].shape[0]
    Hout = (H - 3) // stride + 1
    Wout = (W - 3) // stride + 1
    Mb = Hout * Wout
    M = B * Mb
    assert Hout >= 1 and Wout >= 1
    assert (Cout != Cin) or (stride > 1), \
        "upsample=None config is shape-inconsistent in the reference module"

    # --- fold eval-mode BN into the conv weights (tiny, wrapper-side, once) ---
    bn1_active = H != 1          # AdaptiveBatchNorm2d: identity when input height == 1
    bn_out_active = Hout != 1

    w1 = params["w1"][:, :, 0, 0].T                                   # (Cin, Cmid)
    w3 = params["w3"][:, :, 0, 0].T                                   # (Cmid, Cout)
    # OIHW -> tap-major packed (9*I, O); row index = (kh*3 + kw)*I + i.
    w2 = params["w2"].transpose(2, 3, 1, 0).reshape(9 * Cmid, Cmid)
    wup = params["wup"].transpose(2, 3, 1, 0).reshape(9 * Cin, Cout)

    w1f, b1f = _fold_bn(w1, params["bn1"], bn1_active, eps)
    w2f, b2f = _fold_bn(w2, params["bn2"], bn_out_active, eps)
    w3f, b3f = _fold_bn(w3, params["bn3"], bn_out_active, eps)
    wupf, bupf = _fold_bn(wup, params["bnup"], bn_out_active, eps)

    # bf16 dot operands (MXU-native); biases / epilogue stay f32.
    w1f = w1f.astype(jnp.bfloat16)
    w2f = w2f.astype(jnp.bfloat16)
    w3f = w3f.astype(jnp.bfloat16)
    wupf = wupf.astype(jnp.bfloat16)

    # --- tap-major packed input (M, 9*Cin): 9 strided slices + one lane-axis concat ---
    x_nhwc = x.transpose(0, 2, 3, 1)                                  # (B, H, W, Cin)
    taps = []
    for di in range(3):
        for dj in range(3):
            sl = jax.lax.slice(
                x_nhwc,
                (0, di, dj, 0),
                (B, di + stride * (Hout - 1) + 1, dj + stride * (Wout - 1) + 1, Cin),
                (1, stride, stride, 1))                               # (B, Hout, Wout, Cin)
            taps.append(sl.reshape(B, Mb, Cin))
    xp = jnp.concatenate(taps, axis=-1).reshape(M, 9 * Cin).astype(jnp.bfloat16)

    # --- pad rows to a multiple of block_m (padded rows are garbage, sliced off) ---
    n_blocks = int(pl.cdiv(M, block_m))
    m_pad = n_blocks * block_m
    if m_pad != M:
        xp = jnp.pad(xp, ((0, m_pad - M), (0, 0)))

    flops = 2 * M * (9 * Cin * Cmid + 9 * Cmid * Cmid + Cmid * Cout + 9 * Cin * Cout)
    bytes_accessed = (xp.size * 2
                      + (w1f.size + w2f.size + w3f.size + wupf.size) * 2
                      + (b1f.size + b2f.size + b3f.size + bupf.size) * 4
                      + m_pad * Cout * 4)

    out = pl.pallas_call(
        _bottleneck_kernel,
        out_shape=jax.ShapeDtypeStruct((m_pad, Cout), x.dtype),
        grid_spec=pltpu.PrefetchScalarGridSpec(
            num_scalar_prefetch=0,
            grid=(n_blocks,),
            in_specs=[
                pl.BlockSpec((block_m, 9 * Cin), lambda i: (i, 0)),
                pl.BlockSpec((Cin, Cmid), lambda i: (0, 0)),
                pl.BlockSpec((1, Cmid), lambda i: (0, 0)),
                pl.BlockSpec((9 * Cmid, Cmid), lambda i: (0, 0)),
                pl.BlockSpec((1, Cmid), lambda i: (0, 0)),
                pl.BlockSpec((Cmid, Cout), lambda i: (0, 0)),
                pl.BlockSpec((1, Cout), lambda i: (0, 0)),
                pl.BlockSpec((9 * Cin, Cout), lambda i: (0, 0)),
                pl.BlockSpec((1, Cout), lambda i: (0, 0)),
            ],
            out_specs=pl.BlockSpec((block_m, Cout), lambda i: (i, 0)),
            scratch_shapes=[pltpu.VMEM((block_m, 9 * Cmid), jnp.float32)],
        ),
        compiler_params=pltpu.CompilerParams(dimension_semantics=("parallel",)),
        cost_estimate=pl.CostEstimate(flops=flops, transcendentals=0,
                                      bytes_accessed=bytes_accessed),
    )(xp, w1f, b1f, w2f, b2f, w3f, b3f, wupf, bupf)

    # (M, Cout) -> NCHW (module-facing layout; single small XLA transpose).
    return out[:M].reshape(B, Hout, Wout, Cout).transpose(0, 3, 1, 2)


# ----------------------------------------------------------------------------
# Parameter init (deterministic, synthetic) and pure-JAX reference
# ----------------------------------------------------------------------------
def init_bottleneck_params(key, in_channels, out_channels, stride, mid_channels=None):
    if mid_channels is None:
        mid_channels = in_channels
    ks = jax.random.split(key, 8)

    def conv_w(k, cout, cin, kh, kw):
        fan = cin * kh * kw
        return jax.random.normal(k, (cout, cin, kh, kw), jnp.float32) / np.sqrt(fan)

    def bn_p(k, c):
        k1, k2, k3, k4 = jax.random.split(k, 4)
        return {
            "gamma": jax.random.uniform(k1, (c,), jnp.float32, minval=0.5, maxval=1.5),
            "beta": 0.1 * jax.random.normal(k2, (c,), jnp.float32),
            "mean": 0.1 * jax.random.normal(k3, (c,), jnp.float32),
            "var": jax.random.uniform(k4, (c,), jnp.float32, minval=0.5, maxval=1.5),
        }

    return {
        "w1": conv_w(ks[0], mid_channels, in_channels, 1, 1),
        "w2": conv_w(ks[1], mid_channels, mid_channels, 3, 3),
        "w3": conv_w(ks[2], out_channels, mid_channels, 1, 1),
        "wup": conv_w(ks[3], out_channels, in_channels, 3, 3),
        "bn1": bn_p(ks[4], mid_channels),
        "bn2": bn_p(ks[5], mid_channels),
        "bn3": bn_p(ks[6], out_channels),
        "bnup": bn_p(ks[7], out_channels),
    }


def bottleneck_reference(params, x, *, stride, eps=1e-5):
    def conv(inp, w, s):
        return jax.lax.conv_general_dilated(
            inp, w, window_strides=(s, s), padding="VALID",
            dimension_numbers=("NCHW", "OIHW", "NCHW"))

    def bn(inp, p):
        if inp.shape[-2] == 1:          # AdaptiveBatchNorm2d identity case
            return inp
        scale = p["gamma"] * jax.lax.rsqrt(p["var"] + eps)
        shift = p["beta"] - p["mean"] * scale
        return inp * scale[None, :, None, None] + shift[None, :, None, None]

    out = jax.nn.relu(bn(conv(x, params["w1"], 1), params["bn1"]))
    out = jax.nn.relu(bn(conv(out, params["w2"], stride), params["bn2"]))
    out = bn(conv(out, params["w3"], 1), params["bn3"])
    res = bn(conv(x, params["wup"], stride), params["bnup"])
    return jax.nn.relu(out + res)


# ----------------------------------------------------------------------------
if __name__ == "__main__":
    key = jax.random.PRNGKey(0)
    kx, kp = jax.random.split(key)

    configs = [
        # (B, Cin, H, W, Cmid, Cout, stride)
        (2, 16, 16, 16, 16, 32, 2),   # strided downsample (single grid step)
        (2, 16, 16, 16, 16, 32, 1),   # stride=1, channel-changing shortcut (4 grid steps)
    ]

    ok = True
    for (B, Cin, H, W, Cmid, Cout, stride) in configs:
        kx, kxi = jax.random.split(kx)
        kp, kpi = jax.random.split(kp)
        x = jax.random.normal(kxi, (B, Cin, H, W), jnp.float32)
        params = init_bottleneck_params(kpi, Cin, Cout, stride, mid_channels=Cmid)

        fwd = jax.jit(functools.partial(bottleneck_forward, stride=stride))
        out = jax.block_until_ready(fwd(params, x))

        Hout = (H - 3) // stride + 1
        Wout = (W - 3) // stride + 1
        assert out.shape == (B, Cout, Hout, Wout), out.shape
        assert bool(jnp.all(jnp.isfinite(out)))

        ref = bottleneck_reference(params, x, stride=stride)
        if not bool(jnp.allclose(out, ref, rtol=5e-2, atol=5e-2)):
            ok = False
            print("MISMATCH", (B, Cin, H, W, Cmid, Cout, stride),
                  float(jnp.max(jnp.abs(out - ref))))

    if ok:
        print("KERNEL_OK")
</pallas_src>

<mosaic_0001>
module attributes {stable_mosaic.version = 11 : i64} {
  func.func @_bottleneck_kernel(%arg0: i32, %arg1: memref<128x144xbf16, #tpu.memory_space<vmem>>, %arg2: memref<16x16xbf16, #tpu.memory_space<vmem>>, %arg3: memref<1x16xf32, #tpu.memory_space<vmem>>, %arg4: memref<144x16xbf16, #tpu.memory_space<vmem>>, %arg5: memref<1x16xf32, #tpu.memory_space<vmem>>, %arg6: memref<16x32xbf16, #tpu.memory_space<vmem>>, %arg7: memref<1x32xf32, #tpu.memory_space<vmem>>, %arg8: memref<144x32xbf16, #tpu.memory_space<vmem>>, %arg9: memref<1x32xf32, #tpu.memory_space<vmem>>, %arg10: memref<128x32xf32, #tpu.memory_space<vmem>>, %arg11: memref<128x144xf32, #tpu.memory_space<vmem>>) attributes {dimension_semantics = [#tpu.dimension_semantics<parallel>], iteration_bounds = array<i64: 1>, scalar_prefetch = 0 : i64, scratch_operands = 1 : i64, tpu.core_type = #tpu.core_type<tc>, window_params = [{transform_indices = @transform_0, window_bounds = array<i64: 128, 144>}, {pipeline_mode = #tpu.pipeline_mode<synchronous>, transform_indices = @transform_1, window_bounds = array<i64: 16, 16>}, {pipeline_mode = #tpu.pipeline_mode<synchronous>, transform_indices = @transform_2, window_bounds = array<i64: 1, 16>}, {pipeline_mode = #tpu.pipeline_mode<synchronous>, transform_indices = @transform_3, window_bounds = array<i64: 144, 16>}, {pipeline_mode = #tpu.pipeline_mode<synchronous>, transform_indices = @transform_4, window_bounds = array<i64: 1, 16>}, {pipeline_mode = #tpu.pipeline_mode<synchronous>, transform_indices = @transform_5, window_bounds = array<i64: 16, 32>}, {pipeline_mode = #tpu.pipeline_mode<synchronous>, transform_indices = @transform_6, window_bounds = array<i64: 1, 32>}, {pipeline_mode = #tpu.pipeline_mode<synchronous>, transform_indices = @transform_7, window_bounds = array<i64: 144, 32>}, {pipeline_mode = #tpu.pipeline_mode<synchronous>, transform_indices = @transform_8, window_bounds = array<i64: 1, 32>}, {transform_indices = @transform_9, window_bounds = array<i64: 128, 32>}]} {
    %c0 = arith.constant 0 : index
    %c0_0 = arith.constant 0 : index
    %0 = vector.load %arg1[%c0, %c0_0] : memref<128x144xbf16, #tpu.memory_space<vmem>>, vector<128x144xbf16>
    %c0_1 = arith.constant 0 : index
    %c0_2 = arith.constant 0 : index
    %1 = vector.load %arg2[%c0_1, %c0_2] : memref<16x16xbf16, #tpu.memory_space<vmem>>, vector<16x16xbf16>
    %c0_3 = arith.constant 0 : index
    %c0_4 = arith.constant 0 : index
    %2 = vector.load %arg3[%c0_3, %c0_4] : memref<1x16xf32, #tpu.memory_space<vmem>>, vector<1x16xf32>
    %3 = vector.shape_cast %2 : vector<1x16xf32> to vector<1x16xf32>
    %4 = vector.broadcast %3 : vector<1x16xf32> to vector<128x16xf32>
    %5 = vector.extract_strided_slice %0 {offsets = [0, 0], sizes = [128, 16], strides = [1, 1]} : vector<128x144xbf16> to vector<128x16xbf16>
    %cst = arith.constant dense<0.000000e+00> : vector<128x16xf32>
    %6 = tpu.matmul %5, %1, %cst {dimension_numbers = #tpu.dot_dimension_numbers<[1], [0], [0], [1], [0, 0, 1, 1], [], []>} : vector<128x16xbf16>, vector<16x16xbf16>, vector<128x16xf32> -> vector<128x16xf32>
    %7 = arith.addf %6, %4 : vector<128x16xf32>
    %cst_5 = arith.constant 0.000000e+00 : f32
    %8 = vector.broadcast %cst_5 : f32 to vector<128x16xf32>
    %9 = arith.maximumf %7, %8 : vector<128x16xf32>
    %c0_6 = arith.constant 0 : index
    %c0_7 = arith.constant 0 : index
    %10 = vector.load %arg11[%c0_6, %c0_7] : memref<128x144xf32, #tpu.memory_space<vmem>>, vector<128x16xf32>
    tpu.vector_store %arg11[%c0_6, %c0_7], %9 {strides = array<i32>} : memref<128x144xf32, #tpu.memory_space<vmem>>, vector<128x16xf32>,
    %11 = vector.extract_strided_slice %0 {offsets = [0, 16], sizes = [128, 16], strides = [1, 1]} : vector<128x144xbf16> to vector<128x16xbf16>
    %cst_8 = arith.constant dense<0.000000e+00> : vector<128x16xf32>
    %12 = tpu.matmul %11, %1, %cst_8 {dimension_numbers = #tpu.dot_dimension_numbers<[1], [0], [0], [1], [0, 0, 1, 1], [], []>} : vector<128x16xbf16>, vector<16x16xbf16>, vector<128x16xf32> -> vector<128x16xf32>
    %13 = arith.addf %12, %4 : vector<128x16xf32>
    %cst_9 = arith.constant 0.000000e+00 : f32
    %14 = vector.broadcast %cst_9 : f32 to vector<128x16xf32>
    %15 = arith.maximumf %13, %14 : vector<128x16xf32>
    %c0_10 = arith.constant 0 : index
    %c16 = arith.constant 16 : index
    %16 = vector.load %arg11[%c0_10, %c16] : memref<128x144xf32, #tpu.memory_space<vmem>>, vector<128x16xf32>
    tpu.vector_store %arg11[%c0_10, %c16], %15 {strides = array<i32>} : memref<128x144xf32, #tpu.memory_space<vmem>>, vector<128x16xf32>,
    %17 = vector.extract_strided_slice %0 {offsets = [0, 32], sizes = [128, 16], strides = [1, 1]} : vector<128x144xbf16> to vector<128x16xbf16>
    %cst_11 = arith.constant dense<0.000000e+00> : vector<128x16xf32>
    %18 = tpu.matmul %17, %1, %cst_11 {dimension_numbers = #tpu.dot_dimension_numbers<[1], [0], [0], [1], [0, 0, 1, 1], [], []>} : vector<128x16xbf16>, vector<16x16xbf16>, vector<128x16xf32> -> vector<128x16xf32>
    %19 = arith.addf %18, %4 : vector<128x16xf32>
    %cst_12 = arith.constant 0.000000e+00 : f32
    %20 = vector.broadcast %cst_12 : f32 to vector<128x16xf32>
    %21 = arith.maximumf %19, %20 : vector<128x16xf32>
    %c0_13 = arith.constant 0 : index
    %c32 = arith.constant 32 : index
    %22 = vector.load %arg11[%c0_13, %c32] : memref<128x144xf32, #tpu.memory_space<vmem>>, vector<128x16xf32>
    tpu.vector_store %arg11[%c0_13, %c32], %21 {strides = array<i32>} : memref<128x144xf32, #tpu.memory_space<vmem>>, vector<128x16xf32>,
    %23 = vector.extract_strided_slice %0 {offsets = [0, 48], sizes = [128, 16], strides = [1, 1]} : vector<128x144xbf16> to vector<128x16xbf16>
    %cst_14 = arith.constant dense<0.000000e+00> : vector<128x16xf32>
    %24 = tpu.matmul %23, %1, %cst_14 {dimension_numbers = #tpu.dot_dimension_numbers<[1], [0], [0], [1], [0, 0, 1, 1], [], []>} : vector<128x16xbf16>, vector<16x16xbf16>, vector<128x16xf32> -> vector<128x16xf32>
    %25 = arith.addf %24, %4 : vector<128x16xf32>
    %cst_15 = arith.constant 0.000000e+00 : f32
    %26 = vector.broadcast %cst_15 : f32 to vector<128x16xf32>
    %27 = arith.maximumf %25, %26 : vector<128x16xf32>
    %c0_16 = arith.constant 0 : index
    %c48 = arith.constant 48 : index
    %28 = vector.load %arg11[%c0_16, %c48] : memref<128x144xf32, #tpu.memory_space<vmem>>, vector<128x16xf32>
    tpu.vector_store %arg11[%c0_16, %c48], %27 {strides = array<i32>} : memref<128x144xf32, #tpu.memory_space<vmem>>, vector<128x16xf32>,
    %29 = vector.extract_strided_slice %0 {offsets = [0, 64], sizes = [128, 16], strides = [1, 1]} : vector<128x144xbf16> to vector<128x16xbf16>
    %cst_17 = arith.constant dense<0.000000e+00> : vector<128x16xf32>
    %30 = tpu.matmul %29, %1, %cst_17 {dimension_numbers = #tpu.dot_dimension_numbers<[1], [0], [0], [1], [0, 0, 1, 1], [], []>} : vector<128x16xbf16>, vector<16x16xbf16>, vector<128x16xf32> -> vector<128x16xf32>
    %31 = arith.addf %30, %4 : vector<128x16xf32>
    %cst_18 = arith.constant 0.000000e+00 : f32
    %32 = vector.broadcast %cst_18 : f32 to vector<128x16xf32>
    %33 = arith.maximumf %31, %32 : vector<128x16xf32>
    %c0_19 = arith.constant 0 : index
    %c64 = arith.constant 64 : index
    %34 = vector.load %arg11[%c0_19, %c64] : memref<128x144xf32, #tpu.memory_space<vmem>>, vector<128x16xf32>
    tpu.vector_store %arg11[%c0_19, %c64], %33 {strides = array<i32>} : memref<128x144xf32, #tpu.memory_space<vmem>>, vector<128x16xf32>,
    %35 = vector.extract_strided_slice %0 {offsets = [0, 80], sizes = [128, 16], strides = [1, 1]} : vector<128x144xbf16> to vector<128x16xbf16>
    %cst_20 = arith.constant dense<0.000000e+00> : vector<128x16xf32>
    %36 = tpu.matmul %35, %1, %cst_20 {dimension_numbers = #tpu.dot_dimension_numbers<[1], [0], [0], [1], [0, 0, 1, 1], [], []>} : vector<128x16xbf16>, vector<16x16xbf16>, vector<128x16xf32> -> vector<128x16xf32>
    %37 = arith.addf %36, %4 : vector<128x16xf32>
    %cst_21 = arith.constant 0.000000e+00 : f32
    %38 = vector.broadcast %cst_21 : f32 to vector<128x16xf32>
    %39 = arith.maximumf %37, %38 : vector<128x16xf32>
    %c0_22 = arith.constant 0 : index
    %c80 = arith.constant 80 : index
    %40 = vector.load %arg11[%c0_22, %c80] : memref<128x144xf32, #tpu.memory_space<vmem>>, vector<128x16xf32>
    tpu.vector_store %arg11[%c0_22, %c80], %39 {strides = array<i32>} : memref<128x144xf32, #tpu.memory_space<vmem>>, vector<128x16xf32>,
    %41 = vector.extract_strided_slice %0 {offsets = [0, 96], sizes = [128, 16], strides = [1, 1]} : vector<128x144xbf16> to vector<128x16xbf16>
    %cst_23 = arith.constant dense<0.000000e+00> : vector<128x16xf32>
    %42 = tpu.matmul %41, %1, %cst_23 {dimension_numbers = #tpu.dot_dimension_numbers<[1], [0], [0], [1], [0, 0, 1, 1], [], []>} : vector<128x16xbf16>, vector<16x16xbf16>, vector<128x16xf32> -> vector<128x16xf32>
    %43 = arith.addf %42, %4 : vector<128x16xf32>
    %cst_24 = arith.constant 0.000000e+00 : f32
    %44 = vector.broadcast %cst_24 : f32 to vector<128x16xf32>
    %45 = arith.maximumf %43, %44 : vector<128x16xf32>
    %c0_25 = arith.constant 0 : index
    %c96 = arith.constant 96 : index
    %46 = vector.load %arg11[%c0_25, %c96] : memref<128x144xf32, #tpu.memory_space<vmem>>, vector<128x16xf32>
    tpu.vector_store %arg11[%c0_25, %c96], %45 {strides = array<i32>} : memref<128x144xf32, #tpu.memory_space<vmem>>, vector<128x16xf32>,
    %47 = vector.extract_strided_slice %0 {offsets = [0, 112], sizes = [128, 16], strides = [1, 1]} : vector<128x144xbf16> to vector<128x16xbf16>
    %cst_26 = arith.constant dense<0.000000e+00> : vector<128x16xf32>
    %48 = tpu.matmul %47, %1, %cst_26 {dimension_numbers = #tpu.dot_dimension_numbers<[1], [0], [0], [1], [0, 0, 1, 1], [], []>} : vector<128x16xbf16>, vector<16x16xbf16>, vector<128x16xf32> -> vector<128x16xf32>
    %49 = arith.addf %48, %4 : vector<128x16xf32>
    %cst_27 = arith.constant 0.000000e+00 : f32
    %50 = vector.broadcast %cst_27 : f32 to vector<128x16xf32>
    %51 = arith.maximumf %49, %50 : vector<128x16xf32>
    %c0_28 = arith.constant 0 : index
    %c112 = arith.constant 112 : index
    %52 = vector.load %arg11[%c0_28, %c112] : memref<128x144xf32, #tpu.memory_space<vmem>>, vector<128x16xf32>
    tpu.vector_store %arg11[%c0_28, %c112], %51 {strides = array<i32>} : memref<128x144xf32, #tpu.memory_space<vmem>>, vector<128x16xf32>,
    %53 = vector.extract_strided_slice %0 {offsets = [0, 128], sizes = [128, 16], strides = [1, 1]} : vector<128x144xbf16> to vector<128x16xbf16>
    %cst_29 = arith.constant dense<0.000000e+00> : vector<128x16xf32>
    %54 = tpu.matmul %53, %1, %cst_29 {dimension_numbers = #tpu.dot_dimension_numbers<[1], [0], [0], [1], [0, 0, 1, 1], [], []>} : vector<128x16xbf16>, vector<16x16xbf16>, vector<128x16xf32> -> vector<128x16xf32>
    %55 = arith.addf %54, %4 : vector<128x16xf32>
    %cst_30 = arith.constant 0.000000e+00 : f32
    %56 = vector.broadcast %cst_30 : f32 to vector<128x16xf32>
    %57 = arith.maximumf %55, %56 : vector<128x16xf32>
    %c0_31 = arith.constant 0 : index
    %c128 = arith.constant 128 : index
    %58 = vector.load %arg11[%c0_31, %c128] : memref<128x144xf32, #tpu.memory_space<vmem>>, vector<128x16xf32>
    tpu.vector_store %arg11[%c0_31, %c128], %57 {strides = array<i32>} : memref<128x144xf32, #tpu.memory_space<vmem>>, vector<128x16xf32>,
    %c0_32 = arith.constant 0 : index
    %c0_33 = arith.constant 0 : index
    %59 = vector.load %arg11[%c0_32, %c0_33] : memref<128x144xf32, #tpu.memory_space<vmem>>, vector<128x144xf32>
    %60 = arith.truncf %59 : vector<128x144xf32> to vector<128x144xbf16>
    %c0_34 = arith.constant 0 : index
    %c0_35 = arith.constant 0 : index
    %61 = vector.load %arg4[%c0_34, %c0_35] : memref<144x16xbf16, #tpu.memory_space<vmem>>, vector<144x16xbf16>
    %cst_36 = arith.constant dense<0.000000e+00> : vector<128x16xf32>
    %62 = tpu.matmul %60, %61, %cst_36 {dimension_numbers = #tpu.dot_dimension_numbers<[1], [0], [0], [1], [0, 0, 1, 1], [], []>} : vector<128x144xbf16>, vector<144x16xbf16>, vector<128x16xf32> -> vector<128x16xf32>
    %c0_37 = arith.constant 0 : index
    %c0_38 = arith.constant 0 : index
    %63 = vector.load %arg5[%c0_37, %c0_38] : memref<1x16xf32, #tpu.memory_space<vmem>>, vector<1x16xf32>
    %64 = vector.broadcast %63 : vector<1x16xf32> to vector<128x16xf32>
    %65 = arith.addf %62, %64 : vector<128x16xf32>
    %cst_39 = arith.constant 0.000000e+00 : f32
    %66 = vector.broadcast %cst_39 : f32 to vector<128x16xf32>
    %67 = arith.maximumf %65, %66 : vector<128x16xf32>
    %68 = arith.truncf %67 : vector<128x16xf32> to vector<128x16xbf16>
    %c0_40 = arith.constant 0 : index
    %c0_41 = arith.constant 0 : index
    %69 = vector.load %arg6[%c0_40, %c0_41] : memref<16x32xbf16, #tpu.memory_space<vmem>>, vector<16x32xbf16>
    %cst_42 = arith.constant dense<0.000000e+00> : vector<128x32xf32>
    %70 = tpu.matmul %68, %69, %cst_42 {dimension_numbers = #tpu.dot_dimension_numbers<[1], [0], [0], [1], [0, 0, 1, 1], [], []>} : vector<128x16xbf16>, vector<16x32xbf16>, vector<128x32xf32> -> vector<128x32xf32>
    %c0_43 = arith.constant 0 : index
    %c0_44 = arith.constant 0 : index
    %71 = vector.load %arg7[%c0_43, %c0_44] : memref<1x32xf32, #tpu.memory_space<vmem>>, vector<1x32xf32>
    %72 = vector.broadcast %71 : vector<1x32xf32> to vector<128x32xf32>
    %73 = arith.addf %70, %72 : vector<128x32xf32>
    %c0_45 = arith.constant 0 : index
    %c0_46 = arith.constant 0 : index
    %74 = vector.load %arg8[%c0_45, %c0_46] : memref<144x32xbf16, #tpu.memory_space<vmem>>, vector<144x32xbf16>
    %cst_47 = arith.constant dense<0.000000e+00> : vector<128x32xf32>
    %75 = tpu.matmul %0, %74, %cst_47 {dimension_numbers = #tpu.dot_dimension_numbers<[1], [0], [0], [1], [0, 0, 1, 1], [], []>} : vector<128x144xbf16>, vector<144x32xbf16>, vector<128x32xf32> -> vector<128x32xf32>
    %c0_48 = arith.constant 0 : index
    %c0_49 = arith.constant 0 : index
    %76 = vector.load %arg9[%c0_48, %c0_49] : memref<1x32xf32, #tpu.memory_space<vmem>>, vector<1x32xf32>
    %77 = vector.broadcast %76 : vector<1x32xf32> to vector<128x32xf32>
    %78 = arith.addf %75, %77 : vector<128x32xf32>
    %79 = arith.addf %73, %78 : vector<128x32xf32>
    %cst_50 = arith.constant 0.000000e+00 : f32
    %80 = vector.broadcast %cst_50 : f32 to vector<128x32xf32>
    %81 = arith.maximumf %79, %80 : vector<128x32xf32>
    %c0_51 = arith.constant 0 : index
    %c0_52 = arith.constant 0 : index
    %82 = vector.load %arg10[%c0_51, %c0_52] : memref<128x32xf32, #tpu.memory_space<vmem>>, vector<128x32xf32>
    tpu.vector_store %arg10[%c0_51, %c0_52], %81 {strides = array<i32>} : memref<128x32xf32, #tpu.memory_space<vmem>>, vector<128x32xf32>,
    return
  }
  func.func @transform_0(%arg0: i32) -> (i32, i32) {
    %c0_i32 = arith.constant 0 : i32
    %c0_i32_0 = arith.constant 0 : i32
    return %arg0, %c0_i32 : i32, i32
  }
  func.func @transform_1(%arg0: i32) -> (i32, i32) {
    %c0_i32 = arith.constant 0 : i32
    %c0_i32_0 = arith.constant 0 : i32
    %c0_i32_1 = arith.constant 0 : i32
    return %c0_i32, %c0_i32_0 : i32, i32
  }
  func.func @transform_2(%arg0: i32) -> (i32, i32) {
    %c0_i32 = arith.constant 0 : i32
    %c0_i32_0 = arith.constant 0 : i32
    %c0_i32_1 = arith.constant 0 : i32
    return %c0_i32, %c0_i32_0 : i32, i32
  }
  func.func @transform_3(%arg0: i32) -> (i32, i32) {
    %c0_i32 = arith.constant 0 : i32
    %c0_i32_0 = arith.constant 0 : i32
    %c0_i32_1 = arith.constant 0 : i32
    return %c0_i32, %c0_i32_0 : i32, i32
  }
  func.func @transform_4(%arg0: i32) -> (i32, i32) {
    %c0_i32 = arith.constant 0 : i32
    %c0_i32_0 = arith.constant 0 : i32
    %c0_i32_1 = arith.constant 0 : i32
    return %c0_i32, %c0_i32_0 : i32, i32
  }
  func.func @transform_5(%arg0: i32) -> (i32, i32) {
    %c0_i32 = arith.constant 0 : i32
    %c0_i32_0 = arith.constant 0 : i32
    %c0_i32_1 = arith.constant 0 : i32
    return %c0_i32, %c0_i32_0 : i32, i32
  }
  func.func @transform_6(%arg0: i32) -> (i32, i32) {
    %c0_i32 = arith.constant 0 : i32
    %c0_i32_0 = arith.constant 0 : i32
    %c0_i32_1 = arith.constant 0 : i32
    return %c0_i32, %c0_i32_0 : i32, i32
  }
  func.func @transform_7(%arg0: i32) -> (i32, i32) {
    %c0_i32 = arith.constant 0 : i32
    %c0_i32_0 = arith.constant 0 : i32
    %c0_i32_1 = arith.constant 0 : i32
    return %c0_i32, %c0_i32_0 : i32, i32
  }
  func.func @transform_8(%arg0: i32) -> (i32, i32) {
    %c0_i32 = arith.constant 0 : i32
    %c0_i32_0 = arith.constant 0 : i32
    %c0_i32_1 = arith.constant 0 : i32
    return %c0_i32, %c0_i32_0 : i32, i32
  }
  func.func @transform_9(%arg0: i32) -> (i32, i32) {
    %c0_i32 = arith.constant 0 : i32
    %c0_i32_0 = arith.constant 0 : i32
    return %arg0, %c0_i32 : i32, i32
  }
}

</mosaic_0001>

<bundles_post_ra>
// kernel: bottleneck_forward.1
= control target key start
LH: loop header
LB: loop body
LE: loop exit
PB: predicated region body
PF: predicated region fallthrough
CT: control target
= control target key end

     0   :  { %vm104_vm0 = vcmask 130048   ;;  %s3177_s13 = smov 112   ;;  %s3179_s28 = smov 80   ;;  %vm475_vm1 = vcmask 261248   ;;  %vm709_vm2 = vcmask 392448   ;;  %vm943_vm3 = vcmask 523648   ;;  %s4515_s0 = inlined_call_operand.vmem [shape: bf16[128,144], index: 0, kind: input, shape index: {}]   ;;  %s4516_s1 = inlined_call_operand.vmem [shape: bf16[16,16], index: 1, kind: input, shape index: {}]   ;;  %s4517_s2 = inlined_call_operand.vmem [shape: f32[1,16], index: 2, kind: input, shape index: {}]   ;;  %s4518_s3 = inlined_call_operand.vmem [shape: bf16[144,16], index: 3, kind: input, shape index: {}]   ;;  %s4519_s5 = inlined_call_operand.vmem [shape: bf16[16,32], index: 5, kind: input, shape index: {}]   ;;  %s4520_s7 = inlined_call_operand.vmem [shape: bf16[144,32], index: 7, kind: input, shape index: {}]   ;;  %s4521_s4 = inlined_call_operand.vmem [shape: f32[1,16], index: 4, kind: input, shape index: {}]   ;;  %s4522_s6 = inlined_call_operand.vmem [shape: f32[1,32], index: 6, kind: input, shape index: {}]   ;;  %s4523_s8 = inlined_call_operand.vmem [shape: f32[1,32], index: 8, kind: input, shape index: {}]   ;;  %s4524_s9 = inlined_call_operand.vmem [shape: f32[128,32], index: 9, kind: output, shape index: {}]  }
   0x1   :  { %v3238_v0 = vld [vmem:[%s4515_s0] ss:$8 sps:$4 sm:$0xff]   ;;  %v3250_v2 = vld [vmem:[%s4515_s0 + $0x10] ss:$8 sps:$4 sm:$0xff]   ;;  %s3180_s29 = smov 64   ;;  %s3181_s30 = smov 48  }
   0x2   :  { %v3243_v1 = vld [vmem:[%s4515_s0 + $0x20] ss:$8 sps:$4 sm:$0xff]   ;;  %258 = vrot.lane.b32.xlu0 %v3238_v0, %s3177_s13  ;;  %2946 = vmatprep.mubr.msk.bf16.mxu1 %vm104_vm0, %v3238_v0  ;;  %v3259_v3 = vld [vmem:[%s4515_s0 + $0x30] ss:$8 sps:$4 sm:$0xff]   ;;  %s3182_s10 = smov 32   ;;  %s3183_s11 = smov 16  }
   0x3   :  { %262 = vrot.lane.b32.xlu1 %v3243_v1, %s3177_s13  ;;  %v3266_v4 = vld [vmem:[%s4515_s0 + $0x40] ss:$8 sps:$4 sm:$0xff]   ;;  %v3273_v5 = vld [vmem:[%s4515_s0 + $0x50] ss:$8 sps:$4 sm:$0xff]   ;;  %vm1177_vm4 = vcmask 654848   ;;  %vm1411_vm5 = vcmask 786048  }
   0x4   :  { %v3278_v6 = vld [vmem:[%s4516_s1] sm:$0xff]   ;;  %v3293_v8 = vld [vmem:[%s4515_s0 + $0x70] ss:$8 sps:$4 sm:$0xff]   ;;  %s3178_s1 = smov 96   ;;  %vm1645_vm6 = vcmask 917248   ;;  %vm1879_vm7 = vcmask 1048448  }
   0x5   :  { %v3285_v7 = vld [vmem:[%s4515_s0 + $0x60] ss:$8 sps:$4 sm:$0xff]   ;;  %2944 = vmatprep.subr.bf16.mxu1 %v3278_v6  ;;  %2980 = vmatprep.subr.bf16.mxu0 %v3278_v6  ;;  %vm2697_vm8 = vcmask 261120  }
   0x6   :  { %260 = vrot.lane.b32.xlu0 %v3250_v2, %s3177_s13  ;;  %2945 = vmatpush3.bf16.msra.mxu1 %v3278_v6  ;;  %v3480_v63 = vld [vmem:[%s4517_s2] ss:$0 sm:$0xff] }
   0x7   :  { %264 = vrot.lane.b32.xlu1 %v3259_v3, %s3177_s13  ;;  %2962 = vmatprep.subr.bf16.mxu1 %v3278_v6 }
   0x8   :  { %2981 = vmatpush3.bf16.msra.mxu0 %v3278_v6 }
   0x9   :  { %2947 = vmatmul.mubr.msk.bf16.vlgmr.msra.gmra.mrb[0].mxu1 %vm104_vm0, %v3250_v2  ;;  %3016 = vmatprep.subr.bf16.mxu0 %v3278_v6 }
   0xa   :  { %266 = vrot.lane.b32.xlu0 %v3266_v4, %s3177_s13  ;;  %2950 = vmatprep.mubr.msk.bf16.mxu1 %vm104_vm0, %v3243_v1 }
   0xb   :  { %268 = vrot.lane.b32.xlu1 %v3273_v5, %s3177_s13  ;;  %2963 = vmatpush3.bf16.msra.mxu1 %v3278_v6 }
   0xc   :  { %2998 = vmatprep.subr.bf16.mxu1 %v3278_v6 }
   0xe   :  { %270 = vrot.lane.b32.xlu0 %v3285_v7, %s3177_s13 }
   0xf   :  { %272 = vrot.lane.b32.xlu1 %v3293_v8, %s3177_s13 }
  0x11   :  { %2951 = vmatmul.mubr.msk.bf16.gmra.mrb[4].mxu1 %vm104_vm0, %v3259_v3 }
  0x12   :  { %492 = vrot.lane.b32.xlu0 %v3238_v0, %s3178_s1  ;;  %2954 = vmatprep.mubr.msk.bf16.mxu1 %vm104_vm0, %v3266_v4 }
  0x13   :  { %494 = vrot.lane.b32.xlu1 %v3250_v2, %s3178_s1 }
  0x16   :  { %726 = vrot.lane.b32.xlu0 %v3238_v0, %s3179_s28 }
  0x17   :  { %728 = vrot.lane.b32.xlu1 %v3250_v2, %s3179_s28 }
  0x19   :  { %2955 = vmatmul.mubr.msk.bf16.gmra.mrb[8].mxu1 %vm104_vm0, %v3273_v5 }
  0x1a   :  { %496 = vrot.lane.b32.xlu0 %v3243_v1, %s3178_s1  ;;  %2958 = vmatprep.mubr.msk.bf16.mxu1 %vm104_vm0, %v3285_v7 }
  0x1b   :  { %498 = vrot.lane.b32.xlu1 %v3259_v3, %s3178_s1 }
  0x1e   :  { %730 = vrot.lane.b32.xlu0 %v3243_v1, %s3179_s28 }
  0x1f   :  { %732 = vrot.lane.b32.xlu1 %v3259_v3, %s3179_s28 }
  0x21   :  { %2959 = vmatmul.mubr.msk.bf16.gmra.mrb[12].mxu1 %vm104_vm0, %v3293_v8 }
  0x22   :  { %500 = vrot.lane.b32.xlu0 %v3266_v4, %s3178_s1 }
  0x23   :  { %502 = vrot.lane.b32.xlu1 %v3273_v5, %s3178_s1 }
  0x26   :  { %734 = vrot.lane.b32.xlu0 %v3266_v4, %s3179_s28 }
  0x27   :  { %736 = vrot.lane.b32.xlu1 %v3273_v5, %s3179_s28 }
  0x2a   :  { %504 = vrot.lane.b32.xlu0 %v3285_v7, %s3178_s1 }
  0x2b   :  { %506 = vrot.lane.b32.xlu1 %v3293_v8, %s3178_s1 }
  0x2e   :  { %738 = vrot.lane.b32.xlu0 %v3285_v7, %s3179_s28 }
  0x2f   :  { %740 = vrot.lane.b32.xlu1 %v3293_v8, %s3179_s28 }
  0x32   :  { %960 = vrot.lane.b32.xlu0 %v3238_v0, %s3180_s29 }
  0x33   :  { %962 = vrot.lane.b32.xlu1 %v3250_v2, %s3180_s29 }
  0x36   :  { %1194 = vrot.lane.b32.xlu0 %v3238_v0, %s3181_s30 }
  0x37   :  { %1196 = vrot.lane.b32.xlu1 %v3250_v2, %s3181_s30 }
  0x3a   :  { %964 = vrot.lane.b32.xlu0 %v3243_v1, %s3180_s29 }
  0x3b   :  { %966 = vrot.lane.b32.xlu1 %v3259_v3, %s3180_s29 }
  0x3e   :  { %1198 = vrot.lane.b32.xlu0 %v3243_v1, %s3181_s30 }
  0x3f   :  { %1200 = vrot.lane.b32.xlu1 %v3259_v3, %s3181_s30 }
  0x42   :  { %968 = vrot.lane.b32.xlu0 %v3266_v4, %s3180_s29 }
  0x43   :  { %970 = vrot.lane.b32.xlu1 %v3273_v5, %s3180_s29 }
  0x46   :  { %1202 = vrot.lane.b32.xlu0 %v3266_v4, %s3181_s30 }
  0x47   :  { %1204 = vrot.lane.b32.xlu1 %v3273_v5, %s3181_s30 }
  0x4a   :  { %972 = vrot.lane.b32.xlu0 %v3285_v7, %s3180_s29 }
  0x4b   :  { %974 = vrot.lane.b32.xlu1 %v3293_v8, %s3180_s29 }
  0x4e   :  { %1206 = vrot.lane.b32.xlu0 %v3285_v7, %s3181_s30 }
  0x4f   :  { %1208 = vrot.lane.b32.xlu1 %v3293_v8, %s3181_s30 }
  0x52   :  { %1428 = vrot.lane.b32.xlu0 %v3238_v0, %s3182_s10 }
  0x53   :  { %1430 = vrot.lane.b32.xlu1 %v3250_v2, %s3182_s10 }
  0x56   :  { %1662 = vrot.lane.b32.xlu0 %v3238_v0, %s3183_s11 }
  0x57   :  { %1664 = vrot.lane.b32.xlu1 %v3250_v2, %s3183_s11 }
  0x5a   :  { %1432 = vrot.lane.b32.xlu0 %v3243_v1, %s3182_s10 }
  0x5b   :  { %1434 = vrot.lane.b32.xlu1 %v3259_v3, %s3182_s10 }
  0x5e   :  { %1666 = vrot.lane.b32.xlu0 %v3243_v1, %s3183_s11 }
  0x5f   :  { %1668 = vrot.lane.b32.xlu1 %v3259_v3, %s3183_s11 }
  0x62   :  { %1436 = vrot.lane.b32.xlu0 %v3266_v4, %s3182_s10 }
  0x63   :  { %1438 = vrot.lane.b32.xlu1 %v3273_v5, %s3182_s10 }
  0x66   :  { %1670 = vrot.lane.b32.xlu0 %v3266_v4, %s3183_s11 }
  0x67   :  { %1672 = vrot.lane.b32.xlu1 %v3273_v5, %s3183_s11 }
  0x6a   :  { %1440 = vrot.lane.b32.xlu0 %v3285_v7, %s3182_s10 }
  0x6b   :  { %1442 = vrot.lane.b32.xlu1 %v3293_v8, %s3182_s10 }
  0x6e   :  { %1674 = vrot.lane.b32.xlu0 %v3285_v7, %s3183_s11 }
  0x6f   :  { %1676 = vrot.lane.b32.xlu1 %v3293_v8, %s3183_s11 }
  0x74   :  { %v259_v9 = vpop.permute.xlu0 %258 }
  0x75   :  { %v263_v10 = vpop.permute.xlu1 %262  ;;  %2964 = vmatprep.mubr.msk.bf16.mxu1 %vm104_vm0, %v259_v9 }
  0x78   :  { %v261_v11 = vpop.permute.xlu0 %260 }
  0x79   :  { %v265_v12 = vpop.permute.xlu1 %264  ;;  %2965 = vmatmul.mubr.msk.bf16.vlgmr.msra.gmra.mrb[16].mxu1 %vm104_vm0, %v261_v11 }
  0x7a   :  { %2968 = vmatprep.mubr.msk.bf16.mxu1 %vm104_vm0, %v263_v10  ;;  %2999 = vmatpush3.bf16.msra.mxu1 %v3278_v6 }
  0x7b   :  { %3034 = vmatprep.subr.bf16.mxu1 %v3278_v6 }
  0x7c   :  { %v267_v13 = vpop.permute.xlu0 %266 }
  0x7d   :  { %v269_v14 = vpop.permute.xlu1 %268 }
  0x80   :  { %v271_v15 = vpop.permute.xlu0 %270 }
  0x81   :  { %v273_v16 = vpop.permute.xlu1 %272  ;;  %2969 = vmatmul.mubr.msk.bf16.gmra.mrb[20].mxu1 %vm104_vm0, %v265_v12 }
  0x82   :  { %2972 = vmatprep.mubr.msk.bf16.mxu1 %vm104_vm0, %v267_v13 }
  0x84   :  { %v493_v17 = vpop.permute.xlu0 %492 }
  0x85   :  { %v495_v18 = vpop.permute.xlu1 %494  ;;  %2982 = vmatprep.mubr.msk.bf16.mxu0 %vm104_vm0, %v493_v17 }
  0x86   :  { %2983 = vmatmul.mubr.msk.bf16.vlgmr.msra.gmra.mrb[0].mxu0 %vm104_vm0, %v495_v18 }
  0x87   :  { %3017 = vmatpush3.bf16.msra.mxu0 %v3278_v6 }
  0x88   :  { %v727_v19 = vpop.permute.xlu0 %726  ;;  %3052 = vmatprep.subr.bf16.mxu0 %v3278_v6 }
  0x89   :  { %2973 = vmatmul.mubr.msk.bf16.gmra.mrb[24].mxu1 %vm104_vm0, %v269_v14  ;;  %v729_v20 = vpop.permute.xlu1 %728 }
  0x8a   :  { %2976 = vmatprep.mubr.msk.bf16.mxu1 %vm104_vm0, %v271_v15 }
  0x8c   :  { %v497_v21 = vpop.permute.xlu0 %496 }
  0x8d   :  { %v499_v22 = vpop.permute.xlu1 %498  ;;  %2986 = vmatprep.mubr.msk.bf16.mxu0 %vm104_vm0, %v497_v21 }
  0x8e   :  { %2987 = vmatmul.mubr.msk.bf16.gmra.mrb[4].mxu0 %vm104_vm0, %v499_v22 }
  0x90   :  { %v731_v23 = vpop.permute.xlu0 %730 }
  0x91   :  { %2977 = vmatmul.mubr.msk.bf16.gmra.mrb[28].mxu1 %vm104_vm0, %v273_v16  ;;  %v733_v24 = vpop.permute.xlu1 %732 }
  0x92   :  { %3000 = vmatprep.mubr.msk.bf16.mxu1 %vm104_vm0, %v727_v19 }
  0x94   :  { %v501_v25 = vpop.permute.xlu0 %500 }
  0x95   :  { %v503_v26 = vpop.permute.xlu1 %502  ;;  %2990 = vmatprep.mubr.msk.bf16.mxu0 %vm104_vm0, %v501_v25 }
  0x96   :  { %2991 = vmatmul.mubr.msk.bf16.gmra.mrb[8].mxu0 %vm104_vm0, %v503_v26 }
  0x98   :  { %v735_v27 = vpop.permute.xlu0 %734 }
  0x99   :  { %3001 = vmatmul.mubr.msk.bf16.vlgmr.msra.gmra.mrb[32].mxu1 %vm104_vm0, %v729_v20  ;;  %v737_v28 = vpop.permute.xlu1 %736 }
  0x9a   :  { %3004 = vmatprep.mubr.msk.bf16.mxu1 %vm104_vm0, %v731_v23  ;;  %3035 = vmatpush3.bf16.msra.mxu1 %v3278_v6 }
  0x9b   :  { %3070 = vmatprep.subr.bf16.mxu1 %v3278_v6 }
  0x9c   :  { %v505_v29 = vpop.permute.xlu0 %504 }
  0x9d   :  { %v507_v30 = vpop.permute.xlu1 %506  ;;  %2994 = vmatprep.mubr.msk.bf16.mxu0 %vm104_vm0, %v505_v29 }
  0x9e   :  { %2995 = vmatmul.mubr.msk.bf16.gmra.mrb[12].mxu0 %vm104_vm0, %v507_v30 }
  0xa0   :  { %v739_v31 = vpop.permute.xlu0 %738 }
  0xa1   :  { %3005 = vmatmul.mubr.msk.bf16.gmra.mrb[36].mxu1 %vm104_vm0, %v733_v24  ;;  %v741_v32 = vpop.permute.xlu1 %740 }
  0xa2   :  { %3008 = vmatprep.mubr.msk.bf16.mxu1 %vm104_vm0, %v735_v27 }
  0xa4   :  { %v961_v33 = vpop.permute.xlu0 %960 }
  0xa5   :  { %v963_v34 = vpop.permute.xlu1 %962  ;;  %3018 = vmatprep.mubr.msk.bf16.mxu0 %vm104_vm0, %v961_v33 }
  0xa6   :  { %3019 = vmatmul.mubr.msk.bf16.vlgmr.msra.gmra.mrb[16].mxu0 %vm104_vm0, %v963_v34 }
  0xa7   :  { %3053 = vmatpush3.bf16.msra.mxu0 %v3278_v6 }
  0xa8   :  { %v1195_v35 = vpop.permute.xlu0 %1194  ;;  %3088 = vmatprep.subr.bf16.mxu0 %v3278_v6 }
  0xa9   :  { %3009 = vmatmul.mubr.msk.bf16.gmra.mrb[40].mxu1 %vm104_vm0, %v737_v28  ;;  %v1197_v36 = vpop.permute.xlu1 %1196 }
  0xaa   :  { %3012 = vmatprep.mubr.msk.bf16.mxu1 %vm104_vm0, %v739_v31 }
  0xac   :  { %v965_v37 = vpop.permute.xlu0 %964 }
  0xad   :  { %v967_v38 = vpop.permute.xlu1 %966  ;;  %3022 = vmatprep.mubr.msk.bf16.mxu0 %vm104_vm0, %v965_v37 }
  0xae   :  { %3023 = vmatmul.mubr.msk.bf16.gmra.mrb[20].mxu0 %vm104_vm0, %v967_v38 }
  0xb0   :  { %v1199_v39 = vpop.permute.xlu0 %1198 }
  0xb1   :  { %3013 = vmatmul.mubr.msk.bf16.gmra.mrb[44].mxu1 %vm104_vm0, %v741_v32  ;;  %v1201_v40 = vpop.permute.xlu1 %1200 }
  0xb2   :  { %3036 = vmatprep.mubr.msk.bf16.mxu1 %vm104_vm0, %v1195_v35 }
  0xb4   :  { %v969_v41 = vpop.permute.xlu0 %968 }
  0xb5   :  { %v971_v42 = vpop.permute.xlu1 %970  ;;  %3026 = vmatprep.mubr.msk.bf16.mxu0 %vm104_vm0, %v969_v41 }
  0xb6   :  { %3027 = vmatmul.mubr.msk.bf16.gmra.mrb[24].mxu0 %vm104_vm0, %v971_v42 }
  0xb8   :  { %v1203_v43 = vpop.permute.xlu0 %1202 }
  0xb9   :  { %3037 = vmatmul.mubr.msk.bf16.vlgmr.msra.gmra.mrb[48].mxu1 %vm104_vm0, %v1197_v36  ;;  %v1205_v44 = vpop.permute.xlu1 %1204 }
  0xba   :  { %3040 = vmatprep.mubr.msk.bf16.mxu1 %vm104_vm0, %v1199_v39  ;;  %3071 = vmatpush3.bf16.msra.mxu1 %v3278_v6 }
  0xbc   :  { %v973_v45 = vpop.permute.xlu0 %972 }
  0xbd   :  { %v975_v46 = vpop.permute.xlu1 %974  ;;  %3030 = vmatprep.mubr.msk.bf16.mxu0 %vm104_vm0, %v973_v45 }
  0xbe   :  { %3031 = vmatmul.mubr.msk.bf16.gmra.mrb[28].mxu0 %vm104_vm0, %v975_v46 }
  0xc0   :  { %v1207_v47 = vpop.permute.xlu0 %1206 }
  0xc1   :  { %3041 = vmatmul.mubr.msk.bf16.gmra.mrb[52].mxu1 %vm104_vm0, %v1201_v40  ;;  %v1209_v48 = vpop.permute.xlu1 %1208 }
  0xc2   :  { %3044 = vmatprep.mubr.msk.bf16.mxu1 %vm104_vm0, %v1203_v43 }
  0xc4   :  { %v1429_v49 = vpop.permute.xlu0 %1428 }
  0xc5   :  { %v1431_v50 = vpop.permute.xlu1 %1430  ;;  %3054 = vmatprep.mubr.msk.bf16.mxu0 %vm104_vm0, %v1429_v49 }
  0xc6   :  { %3055 = vmatmul.mubr.msk.bf16.vlgmr.msra.gmra.mrb[32].mxu0 %vm104_vm0, %v1431_v50  ;;  %v33_v50 = vld [vmem:[%s4515_s0] sm:$0xff] }
  0xc7   :  { %3089 = vmatpush3.bf16.msra.mxu0 %v3278_v6 }
  0xc8   :  { %v1663_v51 = vpop.permute.xlu0 %1662 }
  0xc9   :  { %3045 = vmatmul.mubr.msk.bf16.gmra.mrb[56].mxu1 %vm104_vm0, %v1205_v44  ;;  %v1665_v52 = vpop.permute.xlu1 %1664 }
  0xca   :  { %3048 = vmatprep.mubr.msk.bf16.mxu1 %vm104_vm0, %v1207_v47 }
  0xcc   :  { %v1433_v53 = vpop.permute.xlu0 %1432 }
  0xcd   :  { %v1435_v54 = vpop.permute.xlu1 %1434  ;;  %3058 = vmatprep.mubr.msk.bf16.mxu0 %vm104_vm0, %v1433_v53  ;;  %v36_v53 = vld [vmem:[%s4515_s0 + $0x18] sm:$0xff] }
  0xce   :  { %3059 = vmatmul.mubr.msk.bf16.gmra.mrb[36].mxu0 %vm104_vm0, %v1435_v54 }
  0xd0   :  { %v1667_v55 = vpop.permute.xlu0 %1666 }
  0xd1   :  { %3049 = vmatmul.mubr.msk.bf16.gmra.mrb[60].mxu1 %vm104_vm0, %v1209_v48  ;;  %v1669_v56 = vpop.permute.xlu1 %1668 }
  0xd2   :  { %3072 = vmatprep.mubr.msk.bf16.mxu1 %vm104_vm0, %v1663_v51  ;;  %v34_v51 = vld [vmem:[%s4515_s0 + $0x8] sm:$0xff] }
  0xd3   :  { %v3531_v54 = vcombine.high %v33_v50, %v34_v51 }
  0xd4   :  { %v1437_v57 = vpop.permute.xlu0 %1436 }
  0xd5   :  { %v1439_v58 = vpop.permute.xlu1 %1438  ;;  %3062 = vmatprep.mubr.msk.bf16.mxu0 %vm104_vm0, %v1437_v57  ;;  %4533 = vst [vmem:[#allocation3_spill] sm:$0xff] %v3531_v54  ;;  %v38_v57 = vld [vmem:[%s4515_s0 + $0x28] sm:$0xff] }
  0xd6   :  { %3063 = vmatmul.mubr.msk.bf16.gmra.mrb[40].mxu0 %vm104_vm0, %v1439_v58  ;;  %v39_v58 = vld [vmem:[%s4515_s0 + $0x30] sm:$0xff] }
  0xd8   :  { %v1671_v59 = vpop.permute.xlu0 %1670 }
  0xd9   :  { %3073 = vmatmul.mubr.msk.bf16.vlgmr.msra.gmra.mrb[64].mxu1 %vm104_vm0, %v1665_v52  ;;  %v1673_v60 = vpop.permute.xlu1 %1672  ;;  %v35_v52 = vld [vmem:[%s4515_s0 + $0x10] sm:$0xff] }
  0xda   :  { %3076 = vmatprep.mubr.msk.bf16.mxu1 %vm104_vm0, %v1667_v55  ;;  %v3533_v55 = vcombine.high %v35_v52, %v36_v53 }
  0xdc   :  { %v1441_v61 = vpop.permute.xlu0 %1440  ;;  %v2948_v0 = vpop.f32.mrb[0].mxu1  ;;  %4534 = vst [vmem:[#allocation4_spill] sm:$0xff] %v3533_v55 }
  0xdd   :  { %v1443_v62 = vpop.permute.xlu1 %1442  ;;  %3066 = vmatprep.mubr.msk.bf16.mxu0 %vm104_vm0, %v1441_v61  ;;  %v172_v1 = vadd.f32 %v2948_v0, %v3480_v63  ;;  %v163_v2 = vpop.f32.mrb[1].mxu1  ;;  %v42_v0 = vld [vmem:[%s4515_s0 + $0x48] sm:$0xff] }
  0xde   :  { %3067 = vmatmul.mubr.msk.bf16.gmra.mrb[44].mxu0 %vm104_vm0, %v1443_v62  ;;  %v164_v3 = vadd.f32 %v3480_v63, %v163_v2  ;;  %v2949_v4 = vpop.f32.mrb[2].mxu1  ;;  %v41_v62 = vld [vmem:[%s4515_s0 + $0x40] sm:$0xff]  ;;  %v44_v2 = vld [vmem:[%s4515_s0 + $0x58] sm:$0xff] }
  0xdf   :  { %v228_v5 = vmax.f32 %v172_v1, 0.0  ;;  %v175_v6 = vadd.f32 %v2949_v4, %v3480_v63  ;;  %v166_v7 = vpop.f32.mrb[3].mxu1  ;;  %3090 = vmatprep.mubr.msk.bf16.mxu0 %vm104_vm0, %v3531_v54  ;;  %v43_v1 = vld [vmem:[%s4515_s0 + $0x50] sm:$0xff] }
  0xe0   :  { %v226_v8 = vmax.f32 %v164_v3, 0.0  ;;  %v167_v9 = vadd.f32 %v3480_v63, %v166_v7  ;;  %v1675_v12 = vpop.permute.xlu0 %1674  ;;  %v3571_v3 = vcombine.high %v41_v62, %v42_v0  ;;  %v3573_v4 = vcombine.high %v43_v1, %v44_v2  ;;  %v47_v7 = vld [vmem:[%s4515_s0 + $0x70] sm:$0xff] }
  0xe1   :  { %3077 = vmatmul.mubr.msk.bf16.gmra.mrb[68].mxu1 %vm104_vm0, %v1669_v56  ;;  %244 = vst.msk [vmem:[#allocation2 + $0x20] sm:$0xff] %vm104_vm0, %v228_v5  ;;  %v229_v10 = vmax.f32 %v175_v6, 0.0  ;;  %v1677_v24 = vpop.permute.xlu1 %1676  ;;  %v37_v56 = vld [vmem:[%s4515_s0 + $0x20] sm:$0xff]  ;;  %v46_v6 = vld [vmem:[%s4515_s0 + $0x68] sm:$0xff] }
  0xe2   :  { %3080 = vmatprep.mubr.msk.bf16.mxu1 %vm104_vm0, %v1671_v59  ;;  %242 = vst.msk [vmem:[#allocation2] sm:$0xff] %vm104_vm0, %v226_v8  ;;  %v227_v11 = vmax.f32 %v167_v9, 0.0  ;;  %v40_v59 = vld [vmem:[%s4515_s0 + $0x38] sm:$0xff]  ;;  %4537 = vst [vmem:[#allocation7_spill] sm:$0xff] %v3571_v3  ;;  %v45_v5 = vld [vmem:[%s4515_s0 + $0x60] sm:$0xff] }
  0xe3   :  { %245 = vst.msk [vmem:[#allocation2 + $0x30] sm:$0xff] %vm104_vm0, %v229_v10  ;;  %v3553_v61 = vcombine.high %v39_v58, %v40_v59  ;;  %4538 = vst [vmem:[#allocation8_spill] sm:$0xff] %v3573_v4  ;;  %v48_v8 = vld [vmem:[%s4515_s0 + $0x78] sm:$0xff]  ;;  %v3591_v9 = vcombine.high %v45_v5, %v46_v6 }
  0xe4   :  { %243 = vst.msk [vmem:[#allocation2 + $0x10] sm:$0xff] %vm104_vm0, %v227_v11  ;;  %v2952_v13 = vpop.f32.mrb[4].mxu1  ;;  %v3593_v10 = vcombine.high %v47_v7, %v48_v8 }
  0xe5   :  { %v188_v14 = vadd.f32 %v2952_v13, %v3480_v63  ;;  %v179_v15 = vpop.f32.mrb[5].mxu1  ;;  %4536 = vst [vmem:[#allocation6_spill] sm:$0xff] %v3553_v61  ;;  %4539 = vst [vmem:[#allocation9_spill] sm:$0xff] %v3591_v9 }
  0xe6   :  { %v180_v16 = vadd.f32 %v3480_v63, %v179_v15  ;;  %v2953_v17 = vpop.f32.mrb[6].mxu1  ;;  %3091 = vmatmul.mubr.msk.bf16.vlgmr.msra.gmra.mrb[48].mxu0 %vm104_vm0, %v3533_v55  ;;  %4540 = vst [vmem:[#allocation10_spill] sm:$0xff] %v3593_v10 }
  0xe7   :  { %v232_v18 = vmax.f32 %v188_v14, 0.0  ;;  %v191_v19 = vadd.f32 %v2953_v17, %v3480_v63  ;;  %v182_v20 = vpop.f32.mrb[7].mxu1 }
  0xe8   :  { %v230_v21 = vmax.f32 %v180_v16, 0.0  ;;  %v183_v22 = vadd.f32 %v3480_v63, %v182_v20 }
  0xe9   :  { %3081 = vmatmul.mubr.msk.bf16.gmra.mrb[72].mxu1 %vm104_vm0, %v1673_v60  ;;  %248 = vst.msk [vmem:[#allocation2 + $0x60] sm:$0xff] %vm104_vm0, %v232_v18  ;;  %v233_v23 = vmax.f32 %v191_v19, 0.0  ;;  %v3551_v60 = vcombine.high %v37_v56, %v38_v57 }
  0xea   :  { %3084 = vmatprep.mubr.msk.bf16.mxu1 %vm104_vm0, %v1675_v12  ;;  %246 = vst.msk [vmem:[#allocation2 + $0x40] sm:$0xff] %vm104_vm0, %v230_v21  ;;  %v231_v25 = vmax.f32 %v183_v22, 0.0 }
  0xeb   :  { %249 = vst.msk [vmem:[#allocation2 + $0x70] sm:$0xff] %vm104_vm0, %v233_v23  ;;  %4535 = vst [vmem:[#allocation5_spill] sm:$0xff] %v3551_v60  ;;  %3094 = vmatprep.mubr.msk.bf16.mxu0 %vm104_vm0, %v3551_v60 }
  0xec   :  { %247 = vst.msk [vmem:[#allocation2 + $0x50] sm:$0xff] %vm104_vm0, %v231_v25  ;;  %v2956_v26 = vpop.f32.mrb[8].mxu1 }
  0xed   :  { %v204_v27 = vadd.f32 %v2956_v26, %v3480_v63  ;;  %v195_v28 = vpop.f32.mrb[9].mxu1 }
  0xee   :  { %v196_v29 = vadd.f32 %v3480_v63, %v195_v28  ;;  %v2957_v30 = vpop.f32.mrb[10].mxu1  ;;  %3095 = vmatmul.mubr.msk.bf16.gmra.mrb[52].mxu0 %vm104_vm0, %v3553_v61 }
  0xef   :  { %v236_v31 = vmax.f32 %v204_v27, 0.0  ;;  %v207_v32 = vadd.f32 %v2957_v30, %v3480_v63  ;;  %v198_v33 = vpop.f32.mrb[11].mxu1  ;;  %3098 = vmatprep.mubr.msk.bf16.mxu0 %vm104_vm0, %v3571_v3 }
  0xf0   :  { %v234_v34 = vmax.f32 %v196_v29, 0.0  ;;  %v199_v35 = vadd.f32 %v3480_v63, %v198_v33 }
  0xf1   :  { %3085 = vmatmul.mubr.msk.bf16.gmra.mrb[76].mxu1 %vm104_vm0, %v1677_v24  ;;  %252 = vst.msk [vmem:[#allocation2 + $0xa0] sm:$0xff] %vm104_vm0, %v236_v31  ;;  %v237_v36 = vmax.f32 %v207_v32, 0.0 }
  0xf2   :  { %250 = vst.msk [vmem:[#allocation2 + $0x80] sm:$0xff] %vm104_vm0, %v234_v34  ;;  %v235_v37 = vmax.f32 %v199_v35, 0.0 }
  0xf3   :  { %253 = vst.msk [vmem:[#allocation2 + $0xb0] sm:$0xff] %vm104_vm0, %v237_v36 }
  0xf4   :  { %251 = vst.msk [vmem:[#allocation2 + $0x90] sm:$0xff] %vm104_vm0, %v235_v37  ;;  %v2960_v38 = vpop.f32.mrb[12].mxu1 }
  0xf5   :  { %v220_v39 = vadd.f32 %v2960_v38, %v3480_v63  ;;  %v211_v40 = vpop.f32.mrb[13].mxu1 }
  0xf6   :  { %v212_v41 = vadd.f32 %v3480_v63, %v211_v40  ;;  %v2961_v42 = vpop.f32.mrb[14].mxu1  ;;  %3099 = vmatmul.mubr.msk.bf16.gmra.mrb[56].mxu0 %vm104_vm0, %v3573_v4 }
  0xf7   :  { %v240_v43 = vmax.f32 %v220_v39, 0.0  ;;  %v223_v44 = vadd.f32 %v2961_v42, %v3480_v63  ;;  %v214_v45 = vpop.f32.mrb[15].mxu1  ;;  %3102 = vmatprep.mubr.msk.bf16.mxu0 %vm104_vm0, %v3591_v9 }
  0xf8   :  { %v238_v46 = vmax.f32 %v212_v41, 0.0  ;;  %v215_v47 = vadd.f32 %v3480_v63, %v214_v45 }
  0xf9   :  { %256 = vst.msk [vmem:[#allocation2 + $0xe0] sm:$0xff] %vm104_vm0, %v240_v43  ;;  %v241_v48 = vmax.f32 %v223_v44, 0.0 }
  0xfa   :  { %254 = vst.msk [vmem:[#allocation2 + $0xc0] sm:$0xff] %vm104_vm0, %v238_v46  ;;  %v239_v49 = vmax.f32 %v215_v47, 0.0 }
  0xfb   :  { %257 = vst.msk [vmem:[#allocation2 + $0xf0] sm:$0xff] %vm104_vm0, %v241_v48 }
  0xfc   :  { %255 = vst.msk [vmem:[#allocation2 + $0xd0] sm:$0xff] %vm104_vm0, %v239_v49 }
  0xfe   :  { %3103 = vmatmul.mubr.msk.bf16.gmra.mrb[60].mxu0 %vm104_vm0, %v3593_v10 }
 0x14c   :  { %v2966_v11 = vpop.f32.mrb[16].mxu1 }
 0x14d   :  { %v341_v12 = vadd.f32 %v2966_v11, %v3480_v63  ;;  %v332_v13 = vpop.f32.mrb[17].mxu1 }
 0x14e   :  { %v2967_v14 = vpop.f32.mrb[18].mxu1  ;;  %v333_v27 = vadd.f32 %v3480_v63, %v332_v13 }
 0x14f   :  { %v397_v15 = vmax.f32 %v341_v12, 0.0  ;;  %v344_v16 = vadd.f32 %v2967_v14, %v3480_v63  ;;  %v335_v17 = vpop.f32.mrb[19].mxu1 }
 0x150   :  { %v336_v33 = vadd.f32 %v3480_v63, %v335_v17  ;;  %v395_v37 = vmax.f32 %v333_v27, 0.0 }
 0x151   :  { %v398_v18 = vmax.f32 %v344_v16, 0.0  ;;  %431 = vrot.lane.b32.xlu0 %v397_v15, %s3183_s11 }
 0x152   :  { %v396_v40 = vmax.f32 %v336_v33, 0.0 }
 0x153   :  { %433 = vrot.lane.b32.xlu1 %v398_v18, %s3183_s11 }
 0x154   :  { %v2970_v19 = vpop.f32.mrb[20].mxu1 }
 0x155   :  { %v348_v20 = vpop.f32.mrb[21].mxu1  ;;  %v357_v44 = vadd.f32 %v2970_v19, %v3480_v63 }
 0x156   :  { %v2971_v21 = vpop.f32.mrb[22].mxu1  ;;  %v349_v2 = vadd.f32 %v3480_v63, %v348_v20 }
 0x157   :  { %v351_v22 = vpop.f32.mrb[23].mxu1  ;;  %v360_v49 = vadd.f32 %v2971_v21, %v3480_v63  ;;  %v401_v56 = vmax.f32 %v357_v44, 0.0 }
 0x158   :  { %v352_v8 = vadd.f32 %v3480_v63, %v351_v22  ;;  %v399_v14 = vmax.f32 %v349_v2, 0.0 }
 0x159   :  { %v2984_v23 = vpop.f32.mrb[0].mxu0  ;;  %v402_v58 = vmax.f32 %v360_v49, 0.0 }
 0x15a   :  { %v575_v24 = vadd.f32 %v2984_v23, %v3480_v63  ;;  %v566_v25 = vpop.f32.mrb[1].mxu0  ;;  %v400_v17 = vmax.f32 %v352_v8, 0.0 }
 0x15b   :  { %v2985_v26 = vpop.f32.mrb[2].mxu0  ;;  %v567_v38 = vadd.f32 %v3480_v63, %v566_v25 }
 0x15c   :  { %v631_v28 = vmax.f32 %v575_v24, 0.0  ;;  %v578_v29 = vadd.f32 %v2985_v26, %v3480_v63  ;;  %v2974_v30 = vpop.f32.mrb[24].mxu1  ;;  %v569_v31 = vpop.f32.mrb[3].mxu0 }
 0x15d   :  { %v3606_v32 = vpop.f32.mrb[25].mxu1  ;;  %v570_v41 = vadd.f32 %v3480_v63, %v569_v31  ;;  %v629_v45 = vmax.f32 %v567_v38, 0.0  ;;  %v373_v21 = vadd.f32 %v2974_v30, %v3480_v63 }
 0x15e   :  { %v632_v34 = vmax.f32 %v578_v29, 0.0  ;;  %665 = vrot.lane.b32.xlu0 %v631_v28, %s3182_s10  ;;  %v2975_v35 = vpop.f32.mrb[26].mxu1 }
 0x15f   :  { %v3610_v36 = vpop.f32.mrb[27].mxu1  ;;  %v630_v50 = vmax.f32 %v570_v41, 0.0  ;;  %v376_v26 = vadd.f32 %v2975_v35, %v3480_v63  ;;  %v405_v30 = vmax.f32 %v373_v21, 0.0 }
 0x160   :  { %667 = vrot.lane.b32.xlu1 %v632_v34, %s3182_s10  ;;  %v368_v44 = vadd.f32 %v3480_v63, %v3610_v36 }
 0x161   :  { %v2988_v39 = vpop.f32.mrb[4].mxu0  ;;  %v406_v34 = vmax.f32 %v376_v26, 0.0 }
 0x162   :  { %427 = vrot.lane.b32.xlu0 %v395_v37, %s3183_s11  ;;  %v582_v42 = vpop.f32.mrb[5].mxu0  ;;  %v591_v52 = vadd.f32 %v2988_v39, %v3480_v63 }
 0x163   :  { %v2989_v43 = vpop.f32.mrb[6].mxu0  ;;  %v583_v15 = vadd.f32 %v3480_v63, %v582_v42 }
 0x164   :  { %v3617_v46 = vpop.f32.mrb[28].mxu1  ;;  %429 = vrot.lane.b32.xlu1 %v396_v40, %s3183_s11  ;;  %v585_v47 = vpop.f32.mrb[7].mxu0  ;;  %v635_v59 = vmax.f32 %v591_v52, 0.0  ;;  %v594_v62 = vadd.f32 %v2989_v43, %v3480_v63  ;;  %v365_v40 = vadd.f32 %v3480_v63, %v3606_v32 }
 0x165   :  { %v3620_v48 = vpop.f32.mrb[29].mxu1  ;;  %v586_v18 = vadd.f32 %v3480_v63, %v585_v47  ;;  %v633_v22 = vmax.f32 %v583_v15, 0.0 }
 0x166   :  { %v3623_v51 = vpop.f32.mrb[30].mxu1  ;;  %661 = vrot.lane.b32.xlu0 %v629_v45, %s3182_s10  ;;  %v636_v11 = vmax.f32 %v594_v62, 0.0 }
 0x167   :  { %v3627_v53 = vpop.f32.mrb[31].mxu1  ;;  %v634_v27 = vmax.f32 %v586_v18, 0.0 }
 0x168   :  { %663 = vrot.lane.b32.xlu1 %v630_v50, %s3182_s10  ;;  %v403_v50 = vmax.f32 %v365_v40, 0.0 }
 0x169   :  { %v2992_v57 = vpop.f32.mrb[8].mxu0 }
 0x16a   :  { %439 = vrot.lane.b32.xlu0 %v401_v56, %s3183_s11  ;;  %v598_v0 = vpop.f32.mrb[9].mxu0  ;;  %v607_v28 = vadd.f32 %v2992_v57, %v3480_v63  ;;  %v404_v56 = vmax.f32 %v368_v44, 0.0 }
 0x16b   :  { %v2993_v1 = vpop.f32.mrb[10].mxu0  ;;  %v599_v32 = vadd.f32 %v3480_v63, %v598_v0 }
 0x16c   :  { %v3633_v5 = vpop.f32.mrb[32].mxu1  ;;  %441 = vrot.lane.b32.xlu1 %v402_v58, %s3183_s11  ;;  %v601_v6 = vpop.f32.mrb[11].mxu0  ;;  %v639_v37 = vmax.f32 %v607_v28, 0.0  ;;  %v610_v38 = vadd.f32 %v2993_v1, %v3480_v63 }
 0x16d   :  { %v3636_v7 = vpop.f32.mrb[33].mxu1  ;;  %v602_v57 = vadd.f32 %v3480_v63, %v601_v6  ;;  %v637_v62 = vmax.f32 %v599_v32, 0.0  ;;  %v384_v6 = vadd.f32 %v3480_v63, %v3627_v53  ;;  %v809_v26 = vadd.f32 %v3633_v5, %v3480_v63 }
 0x16e   :  { %v3639_v12 = vpop.f32.mrb[34].mxu1  ;;  %673 = vrot.lane.b32.xlu0 %v635_v59, %s3182_s10  ;;  %v640_v45 = vmax.f32 %v610_v38, 0.0  ;;  %v381_v59 = vadd.f32 %v3480_v63, %v3620_v48 }
 0x16f   :  { %v3642_v13 = vpop.f32.mrb[35].mxu1  ;;  %v638_v8 = vmax.f32 %v602_v57, 0.0  ;;  %v408_v18 = vmax.f32 %v384_v6, 0.0  ;;  %v865_v5 = vmax.f32 %v809_v26, 0.0 }
 0x170   :  { %675 = vrot.lane.b32.xlu1 %v636_v11, %s3182_s10  ;;  %v407_v15 = vmax.f32 %v381_v59, 0.0 }
 0x171   :  { %v3646_v16 = vpop.f32.mrb[12].mxu0 }
 0x172   :  { %435 = vrot.lane.b32.xlu0 %v399_v14, %s3183_s11  ;;  %v614_v19 = vpop.f32.mrb[13].mxu0 }
 0x173   :  { %v3650_v20 = vpop.f32.mrb[14].mxu0  ;;  %v615_v11 = vadd.f32 %v3480_v63, %v614_v19 }
 0x174   :  { %v3653_v23 = vpop.f32.mrb[36].mxu1  ;;  %437 = vrot.lane.b32.xlu1 %v400_v17, %s3183_s11  ;;  %v617_v24 = vpop.f32.mrb[15].mxu0 }
 0x175   :  { %v3656_v25 = vpop.f32.mrb[37].mxu1  ;;  %v641_v21 = vmax.f32 %v615_v11, 0.0 }
 0x176   :  { %v3660_v29 = vpop.f32.mrb[38].mxu1  ;;  %669 = vrot.lane.b32.xlu0 %v633_v22, %s3182_s10  ;;  %v618_v22 = vadd.f32 %v3480_v63, %v617_v24  ;;  %v812_v24 = vadd.f32 %v3639_v12, %v3480_v63 }
 0x177   :  { %v3663_v31 = vpop.f32.mrb[39].mxu1 }
 0x178   :  { %671 = vrot.lane.b32.xlu1 %v634_v27, %s3182_s10 }
 0x179   :  { %v3020_v33 = vpop.f32.mrb[16].mxu0 }
 0x17a   :  { %447 = vrot.lane.b32.xlu0 %v405_v30, %s3183_s11  ;;  %v3668_v35 = vpop.f32.mrb[17].mxu0 }
 0x17b   :  { %v3021_v39 = vpop.f32.mrb[18].mxu0 }
 0x17c   :  { %449 = vrot.lane.b32.xlu1 %v406_v34, %s3183_s11  ;;  %v3673_v41 = vpop.f32.mrb[40].mxu1  ;;  %v3675_v42 = vpop.f32.mrb[19].mxu0  ;;  %v642_v34 = vmax.f32 %v618_v22, 0.0  ;;  %v1046_v32 = vadd.f32 %v3021_v39, %v3480_v63  ;;  %v804_v39 = vadd.f32 %v3480_v63, %v3642_v13 }
 0x17d   :  { %v3677_v43 = vpop.f32.mrb[41].mxu1  ;;  %v1038_v22 = vadd.f32 %v3480_v63, %v3675_v42  ;;  %v828_v42 = vadd.f32 %v3660_v29, %v3480_v63 }
 0x17e   :  { %681 = vrot.lane.b32.xlu0 %v639_v37, %s3182_s10  ;;  %v3682_v47 = vpop.f32.mrb[42].mxu1  ;;  %v1043_v37 = vadd.f32 %v3020_v33, %v3480_v63  ;;  %v1100_v6 = vmax.f32 %v1046_v32, 0.0 }
 0x17f   :  { %v3684_v49 = vpop.f32.mrb[43].mxu1 }
 0x180   :  { %683 = vrot.lane.b32.xlu1 %v640_v45, %s3182_s10  ;;  %v866_v45 = vmax.f32 %v812_v24, 0.0  ;;  %v825_v24 = vadd.f32 %v3653_v23, %v3480_v63 }
 0x181   :  { %v3688_v52 = vpop.f32.mrb[20].mxu0 }
 0x182   :  { %443 = vrot.lane.b32.xlu0 %v403_v50, %s3183_s11  ;;  %v3692_v36 = vpop.f32.mrb[21].mxu0  ;;  %v1099_v50 = vmax.f32 %v1043_v37, 0.0 }
 0x183   :  { %v3694_v58 = vpop.f32.mrb[22].mxu0 }
 0x184   :  { %445 = vrot.lane.b32.xlu1 %v404_v56, %s3183_s11  ;;  %v3699_v0 = vpop.f32.mrb[44].mxu1  ;;  %v3701_v1 = vpop.f32.mrb[23].mxu0  ;;  %v801_v56 = vadd.f32 %v3480_v63, %v3636_v7  ;;  %v1035_v7 = vadd.f32 %v3480_v63, %v3668_v35  ;;  %v1062_v29 = vadd.f32 %v3694_v58, %v3480_v63  ;;  %v820_v58 = vadd.f32 %v3480_v63, %v3663_v31 }
 0x185   :  { %v3703_v2 = vpop.f32.mrb[45].mxu1  ;;  %v1054_v9 = vadd.f32 %v3480_v63, %v3701_v1  ;;  %v844_v1 = vadd.f32 %v3682_v47, %v3480_v63 }
 0x186   :  { %677 = vrot.lane.b32.xlu0 %v637_v62, %s3182_s10  ;;  %v3709_v14 = vpop.f32.mrb[46].mxu1  ;;  %v868_v10 = vmax.f32 %v820_v58, 0.0 }
 0x187   :  { %v3711_v48 = vpop.f32.mrb[47].mxu1  ;;  %v874_v61 = vmax.f32 %v844_v1, 0.0 }
 0x188   :  { %679 = vrot.lane.b32.xlu1 %v638_v8, %s3182_s10 }
 0x189   :  { %v3714_v17 = vpop.f32.mrb[24].mxu0 }
 0x18a   :  { %451 = vrot.lane.b32.xlu0 %v407_v15, %s3183_s11  ;;  %v3718_v53 = vpop.f32.mrb[25].mxu0  ;;  %v863_v15 = vmax.f32 %v801_v56, 0.0  ;;  %v869_v56 = vmax.f32 %v825_v24, 0.0  ;;  %v1075_v4 = vadd.f32 %v3714_v17, %v3480_v63 }
 0x18b   :  { %v3720_v19 = vpop.f32.mrb[26].mxu0 }
 0x18c   :  { %453 = vrot.lane.b32.xlu1 %v408_v18, %s3183_s11  ;;  %v3725_v27 = vpop.f32.mrb[48].mxu1  ;;  %v3727_v28 = vpop.f32.mrb[27].mxu0  ;;  %v1107_v60 = vmax.f32 %v1075_v4, 0.0  ;;  %v1078_v47 = vadd.f32 %v3720_v19, %v3480_v63  ;;  %v836_v4 = vadd.f32 %v3480_v63, %v3684_v49  ;;  %v849_v49 = vadd.f32 %v3480_v63, %v3703_v2 }
 0x18d   :  { %v3729_v30 = vpop.f32.mrb[49].mxu1 }
 0x18e   :  { %685 = vrot.lane.b32.xlu0 %v641_v21, %s3182_s10  ;;  %v3735_v38 = vpop.f32.mrb[50].mxu1  ;;  %v864_v21 = vmax.f32 %v804_v39, 0.0  ;;  %v1108_v19 = vmax.f32 %v1078_v47, 0.0  ;;  %v875_v2 = vmax.f32 %v849_v49, 0.0 }
 0x18f   :  { %v3737_v40 = vpop.f32.mrb[51].mxu1 }
 0x190   :  { %687 = vrot.lane.b32.xlu1 %v642_v34, %s3182_s10  ;;  %v1097_v34 = vmax.f32 %v1035_v7, 0.0 }
 0x191   :  { %v3740_v44 = vpop.f32.mrb[28].mxu0 }
 0x192   :  { %899 = vrot.lane.b32.xlu0 %v865_v5, %s3181_s30  ;;  %v3744_v12 = vpop.f32.mrb[29].mxu0 }
 0x193   :  { %v3746_v33 = vpop.f32.mrb[30].mxu0 }
 0x194   :  { %901 = vrot.lane.b32.xlu1 %v866_v45, %s3181_s30  ;;  %v3751_v57 = vpop.f32.mrb[52].mxu1  ;;  %v3753_v59 = vpop.f32.mrb[31].mxu0  ;;  %v1098_v45 = vmax.f32 %v1038_v22, 0.0 }
 0x195   :  { %v3755_v62 = vpop.f32.mrb[53].mxu1 }
 0x196   :  { %1133 = vrot.lane.b32.xlu0 %v1099_v50, %s3180_s29  ;;  %v3760_v8 = vpop.f32.mrb[54].mxu1  ;;  %v1059_v50 = vadd.f32 %v3688_v52, %v3480_v63 }
 0x197   :  { %v3762_v11 = vpop.f32.mrb[55].mxu1 }
 0x198   :  { %1135 = vrot.lane.b32.xlu1 %v1100_v6, %s3180_s29  ;;  %v870_v6 = vmax.f32 %v828_v42, 0.0  ;;  %v1104_v42 = vmax.f32 %v1062_v29, 0.0  ;;  %v841_v29 = vadd.f32 %v3673_v41, %v3480_v63 }
 0x199   :  { %v3767_v18 = vpop.f32.mrb[32].mxu0 }
 0x19a   :  { %895 = vrot.lane.b32.xlu0 %v863_v15, %s3181_s30  ;;  %v3772_v13 = vpop.f32.mrb[33].mxu0  ;;  %v1103_v15 = vmax.f32 %v1059_v50, 0.0 }
 0x19b   :  { %v3774_v26 = vpop.f32.mrb[34].mxu0 }
 0x19c   :  { %897 = vrot.lane.b32.xlu1 %v864_v21, %s3181_s30  ;;  %v3779_v35 = vpop.f32.mrb[56].mxu1  ;;  %v3781_v37 = vpop.f32.mrb[35].mxu0  ;;  %v817_v21 = vadd.f32 %v3480_v63, %v3656_v25  ;;  %v1051_v25 = vadd.f32 %v3480_v63, %v3692_v36 }
 0x19d   :  { %v3783_v5 = vpop.f32.mrb[57].mxu1 }
 0x19e   :  { %1129 = vrot.lane.b32.xlu0 %v1097_v34, %s3180_s29  ;;  %v3790_v32 = vpop.f32.mrb[58].mxu1 }
 0x19f   :  { %v3792_v23 = vpop.f32.mrb[59].mxu1 }
 0x1a0   :  { %1131 = vrot.lane.b32.xlu1 %v1098_v45, %s3180_s29 }
 0x1a1   :  { %v3795_v39 = vpop.f32.mrb[36].mxu0 }
 0x1a2   :  { %907 = vrot.lane.b32.xlu0 %v869_v56, %s3181_s30  ;;  %v3800_v7 = vpop.f32.mrb[37].mxu0  ;;  %v867_v56 = vmax.f32 %v817_v21, 0.0  ;;  %v1101_v21 = vmax.f32 %v1051_v25, 0.0 }
 0x1a3   :  { %v3802_v52 = vpop.f32.mrb[38].mxu0 }
 0x1a4   :  { %909 = vrot.lane.b32.xlu1 %v870_v6, %s3181_s30  ;;  %v3807_v22 = vpop.f32.mrb[60].mxu1  ;;  %v3809_v24 = vpop.f32.mrb[39].mxu0 }
 0x1a5   :  { %v3811_v34 = vpop.f32.mrb[61].mxu1 }
 0x1a6   :  { %1141 = vrot.lane.b32.xlu0 %v1103_v15, %s3180_s29  ;;  %v3816_v45 = vpop.f32.mrb[62].mxu1 }
 0x1a7   :  { %v3818_v50 = vpop.f32.mrb[63].mxu1 }
 0x1a8   :  { %1143 = vrot.lane.b32.xlu1 %v1104_v42, %s3180_s29 }
 0x1a9   :  { %v3823_v6 = vpop.f32.mrb[40].mxu0 }
 0x1aa   :  { %903 = vrot.lane.b32.xlu0 %v867_v56, %s3181_s30  ;;  %v3828_v31 = vpop.f32.mrb[41].mxu0  ;;  %v1102_v56 = vmax.f32 %v1054_v9, 0.0 }
 0x1ab   :  { %v3830_v15 = vpop.f32.mrb[42].mxu0 }
 0x1ac   :  { %905 = vrot.lane.b32.xlu1 %v868_v10, %s3181_s30  ;;  %v3835_v36 = vpop.f32.mrb[64].mxu1  ;;  %v3837_v42 = vpop.f32.mrb[43].mxu0  ;;  %v873_v10 = vmax.f32 %v841_v29, 0.0 }
 0x1ad   :  { %v3839_v58 = vpop.f32.mrb[65].mxu1 }
 0x1ae   :  { %1137 = vrot.lane.b32.xlu0 %v1101_v21, %s3180_s29  ;;  %v3846_v3 = vpop.f32.mrb[66].mxu1  ;;  %v833_v21 = vadd.f32 %v3480_v63, %v3677_v43  ;;  %v872_v43 = vmax.f32 %v836_v4, 0.0  ;;  %v1083_v4 = vadd.f32 %v3480_v63, %v3744_v12  ;;  %v1277_v12 = vadd.f32 %v3725_v27, %v3480_v63 }
 0x1af   :  { %v3848_v41 = vpop.f32.mrb[67].mxu1 }
 0x1b0   :  { %1139 = vrot.lane.b32.xlu1 %v1102_v56, %s3180_s29  ;;  %v871_v54 = vmax.f32 %v833_v21, 0.0 }
 0x1b1   :  { %v3851_v25 = vpop.f32.mrb[44].mxu0 }
 0x1b2   :  { %4541 = vst [vmem:[#allocation11_spill] sm:$0xff] %v3851_v25  ;;  %915 = vrot.lane.b32.xlu0 %v873_v10, %s3181_s30  ;;  %v3856_v9 = vpop.f32.mrb[45].mxu0  ;;  %v1086_v25 = vadd.f32 %v3480_v63, %v3753_v59  ;;  %v1511_v59 = vadd.f32 %v3767_v18, %v3480_v63  ;;  %v1272_v18 = vadd.f32 %v3480_v63, %v3737_v40 }
 0x1b3   :  { %v3858_v17 = vpop.f32.mrb[46].mxu0  ;;  %v1293_v40 = vadd.f32 %v3751_v57, %v3480_v63 }
 0x1b4   :  { %4542 = vst [vmem:[#allocation12_spill] sm:$0xff] %v3858_v17  ;;  %917 = vrot.lane.b32.xlu1 %v874_v61, %s3181_s30  ;;  %v3863_v29 = vpop.f32.mrb[68].mxu1  ;;  %v3865_v56 = vpop.f32.mrb[47].mxu0  ;;  %v1067_v61 = vadd.f32 %v3480_v63, %v3718_v53  ;;  %v1070_v17 = vadd.f32 %v3480_v63, %v3727_v28  ;;  %v852_v53 = vadd.f32 %v3480_v63, %v3711_v48 }
 0x1b5   :  { %v3867_v1 = vpop.f32.mrb[69].mxu1 }
 0x1b6   :  { %1149 = vrot.lane.b32.xlu0 %v1107_v60, %s3180_s29  ;;  %v3872_v10 = vpop.f32.mrb[70].mxu1  ;;  %v1105_v60 = vmax.f32 %v1067_v61, 0.0  ;;  %v876_v61 = vmax.f32 %v852_v53, 0.0  ;;  %v1280_v53 = vadd.f32 %v3735_v38, %v3480_v63  ;;  %v1514_v38 = vadd.f32 %v3774_v26, %v3480_v63 }
 0x1b7   :  { %v3874_v55 = vpop.f32.mrb[71].mxu1  ;;  %v1332_v26 = vmax.f32 %v1272_v18, 0.0  ;;  %v3184_v18 = vmov 0  }
 0x1b8   :  { %1151 = vrot.lane.b32.xlu1 %v1108_v19, %s3180_s29  ;;  %v1106_v19 = vmax.f32 %v1070_v17, 0.0  ;;  %2224 = vmatprep.subr.bf16.mxu1 %v3184_v18 }
 0x1ba   :  { %911 = vrot.lane.b32.xlu0 %v871_v54, %s3181_s30 }
 0x1bc   :  { %913 = vrot.lane.b32.xlu1 %v872_v43, %s3181_s30  ;;  %v3885_v47 = vpop.f32.mrb[72].mxu1  ;;  %v1109_v43 = vmax.f32 %v1083_v4, 0.0 }
 0x1bd   :  { %v3887_v21 = vpop.f32.mrb[73].mxu1 }
 0x1be   :  { %1145 = vrot.lane.b32.xlu0 %v1105_v60, %s3180_s29  ;;  %v3894_v54 = vpop.f32.mrb[74].mxu1 }
 0x1bf   :  { %v3896_v28 = vpop.f32.mrb[75].mxu1 }
 0x1c0   :  { %1147 = vrot.lane.b32.xlu1 %v1106_v19, %s3180_s29  ;;  %v1110_v19 = vmax.f32 %v1086_v25, 0.0  ;;  %v1269_v25 = vadd.f32 %v3480_v63, %v3729_v30  ;;  %v1506_v30 = vadd.f32 %v3480_v63, %v3781_v37 }
 0x1c2   :  { %919 = vrot.lane.b32.xlu0 %v875_v2, %s3181_s30  ;;  %v1333_v2 = vmax.f32 %v1277_v12, 0.0  ;;  %v1331_v12 = vmax.f32 %v1269_v25, 0.0  ;;  %v1566_v37 = vmax.f32 %v1506_v30, 0.0 }
 0x1c3   :  { %v432_v48 = vpop.permute.xlu0 %431 }
 0x1c4   :  { %478 = vst.msk [vmem:[#allocation2 + $0x20] sm:$0xff] %vm475_vm1, %v432_v48  ;;  %921 = vrot.lane.b32.xlu1 %v876_v61, %s3181_s30  ;;  %v3906_v17 = vpop.f32.mrb[76].mxu1  ;;  %v1334_v61 = vmax.f32 %v1280_v53, 0.0  ;;  %v1567_v48 = vmax.f32 %v1511_v59, 0.0  ;;  %v1296_v59 = vadd.f32 %v3760_v8, %v3480_v63 }
 0x1c5   :  { %v434_v49 = vpop.permute.xlu1 %433  ;;  %v3908_v60 = vpop.f32.mrb[77].mxu1 }
 0x1c6   :  { %479 = vst.msk [vmem:[#allocation2 + $0x30] sm:$0xff] %vm475_vm1, %v434_v49  ;;  %1153 = vrot.lane.b32.xlu0 %v1109_v43, %s3180_s29  ;;  %v3916_v27 = vpop.f32.mrb[78].mxu1  ;;  %v1568_v43 = vmax.f32 %v1514_v38, 0.0  ;;  %v1503_v49 = vadd.f32 %v3480_v63, %v3772_v13  ;;  %v1527_v13 = vadd.f32 %v3795_v39, %v3480_v63  ;;  %v1337_v38 = vmax.f32 %v1293_v40, 0.0  ;;  %v3149_v39 = vld [vmem:[%s4518_s3] sm:$0xff]  }
 0x1c7   :  { %v3918_v4 = vpop.f32.mrb[79].mxu1  ;;  %v1338_v57 = vmax.f32 %v1296_v59, 0.0  ;;  %2225 = vmatpush1.bf16.msra.mxu1 %v3149_v39  ;;  %v1519_v40 = vadd.f32 %v3480_v63, %v3800_v7  ;;  %v1309_v7 = vadd.f32 %v3779_v35, %v3480_v63  ;;  %v3092_v35 = vpop.f32.mrb[48].mxu0 }
 0x1c8   :  { %1155 = vrot.lane.b32.xlu1 %v1110_v19, %s3180_s29  ;;  %v1571_v25 = vmax.f32 %v1527_v13, 0.0  ;;  %2226 = vmatprep.subr.bf16.mxu1 %v3184_v18 }
 0x1c9   :  { %v1341_v39 = vmax.f32 %v1309_v7, 0.0  ;;  %v3154_v7 = vld [vmem:[%s4518_s3 + $0x28] sm:$0xff]  }
 0x1ca   :  { %1367 = vrot.lane.b32.xlu0 %v1333_v2, %s3179_s28  ;;  %v1565_v2 = vmax.f32 %v1503_v49, 0.0  ;;  %v1285_v49 = vadd.f32 %v3480_v63, %v3755_v62 }
 0x1cc   :  { %1369 = vrot.lane.b32.xlu1 %v1334_v61, %s3179_s28  ;;  %v1335_v62 = vmax.f32 %v1285_v49, 0.0 }
 0x1ce   :  { %1601 = vrot.lane.b32.xlu0 %v1567_v48, %s3178_s1 }
 0x1d0   :  { %v666_v53 = vpop.permute.xlu0 %665  ;;  %1603 = vrot.lane.b32.xlu1 %v1568_v43, %s3178_s1  ;;  %v1530_v43 = vadd.f32 %v3802_v52, %v3480_v63  ;;  %v1288_v52 = vadd.f32 %v3480_v63, %v3762_v11  ;;  %v3151_v11 = vld [vmem:[%s4518_s3 + $0x10] sm:$0xff]  }
 0x1d1   :  { %712 = vst.msk [vmem:[#allocation2 + $0x20] sm:$0xff] %vm709_vm2, %v666_v53 }
 0x1d2   :  { %v668_v19 = vpop.permute.xlu1 %667  ;;  %1363 = vrot.lane.b32.xlu0 %v1331_v12, %s3179_s28  ;;  %v1572_v30 = vmax.f32 %v1530_v43, 0.0  ;;  %v1336_v13 = vmax.f32 %v1288_v52, 0.0 }
 0x1d3   :  { %713 = vst.msk [vmem:[#allocation2 + $0x30] sm:$0xff] %vm709_vm2, %v668_v19 }
 0x1d4   :  { %1365 = vrot.lane.b32.xlu1 %v1332_v26, %s3179_s28  ;;  %v428_v61 = vpop.permute.xlu0 %427  ;;  %v3150_v26 = vld [vmem:[%s4518_s3 + $0x8] sm:$0xff]  }
 0x1d5   :  { %476 = vst.msk [vmem:[#allocation2] sm:$0xff] %vm475_vm1, %v428_v61  ;;  %2227 = vmatpush1.bf16.msra.mxu1 %v3150_v26 }
 0x1d6   :  { %v430_v48 = vpop.permute.xlu1 %429  ;;  %1597 = vrot.lane.b32.xlu0 %v1565_v2, %s3178_s1  ;;  %2228 = vmatprep.subr.bf16.mxu1 %v3184_v18  ;;  %v1522_v2 = vadd.f32 %v3480_v63, %v3809_v24  ;;  %v1312_v24 = vadd.f32 %v3790_v32, %v3480_v63  ;;  %v1987_v32 = vadd.f32 %v3092_v35, %v3480_v63 }
 0x1d7   :  { %477 = vst.msk [vmem:[#allocation2 + $0x10] sm:$0xff] %vm475_vm1, %v430_v48 }
 0x1d8   :  { %1599 = vrot.lane.b32.xlu1 %v1566_v37, %s3178_s1  ;;  %v662_v8 = vpop.permute.xlu0 %661  ;;  %v1569_v37 = vmax.f32 %v1519_v40, 0.0  ;;  %v1342_v49 = vmax.f32 %v1312_v24, 0.0  ;;  %v4010_v40 = vld [vmem:[%s4517_s2] ss:$0 sm:$0xff] }
 0x1d9   :  { %710 = vst.msk [vmem:[#allocation2] sm:$0xff] %vm709_vm2, %v662_v8  ;;  %2229 = vmatpush1.bf16.msra.mxu1 %v3151_v11  ;;  %v1538_v35 = vadd.f32 %v4010_v40, %v3837_v42  ;;  %v1748_v42 = vadd.f32 %v4010_v40, %v3846_v3 }
 0x1da   :  { %v664_v12 = vpop.permute.xlu1 %663  ;;  %1375 = vrot.lane.b32.xlu0 %v1337_v38, %s3179_s28  ;;  %2230 = vmatprep.subr.bf16.mxu1 %v3184_v18  ;;  %v3152_v38 = vld [vmem:[%s4518_s3 + $0x18] sm:$0xff]  }
 0x1db   :  { %711 = vst.msk [vmem:[#allocation2 + $0x10] sm:$0xff] %vm709_vm2, %v664_v12  ;;  %v1978_v12 = vpop.f32.mrb[49].mxu0 }
 0x1dc   :  { %1377 = vrot.lane.b32.xlu1 %v1338_v57, %s3179_s28  ;;  %v440_v53 = vpop.permute.xlu0 %439  ;;  %v1570_v57 = vmax.f32 %v1522_v2, 0.0  ;;  %v3093_v26 = vpop.f32.mrb[50].mxu0 }
 0x1dd   :  { %482 = vst.msk [vmem:[#allocation2 + $0x60] sm:$0xff] %vm475_vm1, %v440_v53  ;;  %2231 = vmatpush1.bf16.msra.mxu1 %v3152_v38  ;;  %v1979_v53 = vadd.f32 %v3480_v63, %v1978_v12  ;;  %v1981_v11 = vpop.f32.mrb[51].mxu0  ;;  %v3156_v12 = vld [vmem:[%s4518_s3 + $0x38] sm:$0xff]  }
 0x1de   :  { %v442_v19 = vpop.permute.xlu1 %441  ;;  %1609 = vrot.lane.b32.xlu0 %v1571_v25, %s3178_s1  ;;  %v1543_v25 = vadd.f32 %v3823_v6, %v3480_v63  ;;  %2232 = vmatprep.subr.bf16.mxu1 %v3184_v18  ;;  %v3153_v6 = vld [vmem:[%s4518_s3 + $0x20] sm:$0xff]   ;;  %v1982_v2 = vadd.f32 %v4010_v40, %v1981_v11 }
 0x1df   :  { %483 = vst.msk [vmem:[#allocation2 + $0x70] sm:$0xff] %vm475_vm1, %v442_v19  ;;  %v3157_v11 = vld [vmem:[%s4518_s3 + $0x40] sm:$0xff]  }
 0x1e0   :  { %1611 = vrot.lane.b32.xlu1 %v1572_v30, %s3178_s1  ;;  %v674_v59 = vpop.permute.xlu0 %673  ;;  %v1575_v52 = vmax.f32 %v1543_v25, 0.0  ;;  %v1546_v30 = vadd.f32 %v3830_v15, %v3480_v63  ;;  %v1301_v63 = vadd.f32 %v4010_v40, %v3783_v5  ;;  %v3155_v25 = vld [vmem:[%s4518_s3 + $0x30] sm:$0xff]  }
 0x1e1   :  { %716 = vst.msk [vmem:[#allocation2 + $0x60] sm:$0xff] %vm709_vm2, %v674_v59  ;;  %v1990_v59 = vadd.f32 %v4010_v40, %v3093_v26  ;;  %2233 = vmatpush1.bf16.msra.mxu1 %v3153_v6  ;;  %v1574_v6 = vmax.f32 %v1538_v35, 0.0  ;;  %v3096_v26 = vpop.f32.mrb[52].mxu0  ;;  %v1551_v35 = vadd.f32 %v4010_v40, %v3856_v9  ;;  %v1554_v9 = vadd.f32 %v4010_v40, %v3865_v56 }
 0x1e2   :  { %v676_v61 = vpop.permute.xlu1 %675  ;;  %1371 = vrot.lane.b32.xlu0 %v1335_v62, %s3179_s28  ;;  %v2043_v62 = vmax.f32 %v1987_v32, 0.0  ;;  %2234 = vmatprep.subr.bf16.mxu1 %v3184_v18  ;;  %v1576_v38 = vmax.f32 %v1546_v30, 0.0  ;;  %v1339_v24 = vmax.f32 %v1301_v63, 0.0  ;;  %v1802_v63 = vmax.f32 %v1748_v42, 0.0 }
 0x1e3   :  { %717 = vst.msk [vmem:[#allocation2 + $0x70] sm:$0xff] %vm709_vm2, %v676_v61  ;;  %v2044_v61 = vmax.f32 %v1990_v59, 0.0  ;;  %v1994_v59 = vpop.f32.mrb[53].mxu0 }
 0x1e4   :  { %1373 = vrot.lane.b32.xlu1 %v1336_v13, %s3179_s28  ;;  %v436_v48 = vpop.permute.xlu0 %435  ;;  %v2041_v13 = vmax.f32 %v1979_v53, 0.0  ;;  %2059 = vst.msk [vmem:[#allocation2 + $0x28] sm:$0xff] %vm104_vm0, %v2043_v62  ;;  %v2003_v62 = vadd.f32 %v4010_v40, %v3096_v26 }
 0x1e5   :  { %480 = vst.msk [vmem:[#allocation2 + $0x40] sm:$0xff] %vm475_vm1, %v436_v48  ;;  %v1304_v48 = vadd.f32 %v4010_v40, %v3792_v23  ;;  %2235 = vmatpush1.bf16.msra.mxu1 %v3154_v7 }
 0x1e6   :  { %v438_v8 = vpop.permute.xlu1 %437  ;;  %1605 = vrot.lane.b32.xlu0 %v1569_v37, %s3178_s1  ;;  %2057 = vst.msk [vmem:[#allocation2 + $0x8] sm:$0xff] %vm104_vm0, %v2041_v13  ;;  %v2042_v37 = vmax.f32 %v1982_v2, 0.0  ;;  %2060 = vst.msk [vmem:[#allocation2 + $0x38] sm:$0xff] %vm104_vm0, %v2044_v61  ;;  %2236 = vmatprep.subr.bf16.mxu1 %v3184_v18  ;;  %v1995_v13 = vadd.f32 %v4010_v40, %v1994_v59  ;;  %v3097_v2 = vpop.f32.mrb[54].mxu0  ;;  %v2047_v61 = vmax.f32 %v2003_v62, 0.0 }
 0x1e7   :  { %481 = vst.msk [vmem:[#allocation2 + $0x50] sm:$0xff] %vm475_vm1, %v438_v8  ;;  %v1340_v8 = vmax.f32 %v1304_v48, 0.0  ;;  %v2006_v7 = vadd.f32 %v4010_v40, %v3097_v2  ;;  %v1756_v62 = vadd.f32 %v4010_v40, %v3874_v55 }
 0x1e8   :  { %1607 = vrot.lane.b32.xlu1 %v1570_v57, %s3178_s1  ;;  %v670_v43 = vpop.permute.xlu0 %669  ;;  %2058 = vst.msk [vmem:[#allocation2 + $0x18] sm:$0xff] %vm104_vm0, %v2042_v37  ;;  %v1535_v57 = vadd.f32 %v4010_v40, %v3828_v31  ;;  %v1745_v31 = vadd.f32 %v4010_v40, %v3835_v36  ;;  %v1997_v37 = vpop.f32.mrb[55].mxu0  ;;  %v2045_v48 = vmax.f32 %v1995_v13, 0.0  ;;  %2063 = vst.msk [vmem:[#allocation2 + $0x68] sm:$0xff] %vm104_vm0, %v2047_v61 }
 0x1e9   :  { %714 = vst.msk [vmem:[#allocation2 + $0x40] sm:$0xff] %vm709_vm2, %v670_v43  ;;  %2237 = vmatpush1.bf16.msra.mxu1 %v3155_v25  ;;  %v1320_v25 = vadd.f32 %v4010_v40, %v3818_v50  ;;  %v3100_v56 = vpop.f32.mrb[56].mxu0 }
 0x1ea   :  { %v672_v19 = vpop.permute.xlu1 %671  ;;  %1383 = vrot.lane.b32.xlu0 %v1341_v39, %s3179_s28  ;;  %2238 = vmatprep.subr.bf16.mxu1 %v3184_v18  ;;  %v1573_v43 = vmax.f32 %v1535_v57, 0.0  ;;  %v1801_v30 = vmax.f32 %v1745_v31, 0.0  ;;  %v2048_v57 = vmax.f32 %v2006_v7, 0.0  ;;  %2061 = vst.msk [vmem:[#allocation2 + $0x48] sm:$0xff] %vm104_vm0, %v2045_v48  ;;  %v1804_v48 = vmax.f32 %v1756_v62, 0.0 }
 0x1eb   :  { %715 = vst.msk [vmem:[#allocation2 + $0x50] sm:$0xff] %vm709_vm2, %v672_v19  ;;  %v1737_v19 = vadd.f32 %v4010_v40, %v3839_v58  ;;  %v1740_v58 = vadd.f32 %v4010_v40, %v3848_v41  ;;  %v1344_v50 = vmax.f32 %v1320_v25, 0.0  ;;  %v1777_v25 = vadd.f32 %v4010_v40, %v3885_v47 }
 0x1ec   :  { %1385 = vrot.lane.b32.xlu1 %v1342_v49, %s3179_s28  ;;  %v448_v15 = vpop.permute.xlu0 %447  ;;  %2064 = vst.msk [vmem:[#allocation2 + $0x78] sm:$0xff] %vm104_vm0, %v2048_v57 }
 0x1ed   :  { %486 = vst.msk [vmem:[#allocation2 + $0xa0] sm:$0xff] %vm475_vm1, %v448_v15  ;;  %2239 = vmatpush1.bf16.msra.mxu1 %v3156_v12  ;;  %v2074_v53 = vld [vmem:[#allocation2 + $0x8] sm:$0xff]  ;;  %v1761_v12 = vadd.f32 %v4010_v40, %v3863_v29  ;;  %v1753_v29 = vadd.f32 %v4010_v40, %v3867_v1 }
 0x1ee   :  { %v450_v5 = vpop.permute.xlu1 %449  ;;  %1617 = vrot.lane.b32.xlu0 %v1575_v52, %s3178_s1  ;;  %2240 = vmatprep.subr.bf16.mxu1 %v3184_v18 }
 0x1ef   :  { %487 = vst.msk [vmem:[#allocation2 + $0xb0] sm:$0xff] %vm475_vm1, %v450_v5  ;;  %v2076_v36 = vld [vmem:[#allocation2 + $0x18] sm:$0xff]  ;;  %v1317_v5 = vadd.f32 %v4010_v40, %v3811_v34 }
 0x1f0   :  { %1619 = vrot.lane.b32.xlu1 %v1576_v38, %s3178_s1  ;;  %v682_v23 = vpop.permute.xlu0 %681  ;;  %v2106_v52 = vpack.c.bf16 %v2076_v36, %v2074_v53  ;;  %v1998_v38 = vadd.f32 %v4010_v40, %v1997_v37  ;;  %v1805_v36 = vmax.f32 %v1761_v12, 0.0  ;;  %v392_v37 = vadd.f32 %v4010_v40, %v3623_v51 }
 0x1f1   :  { %720 = vst.msk [vmem:[#allocation2 + $0xa0] sm:$0xff] %vm709_vm2, %v682_v23  ;;  %2241 = vmatpush1.bf16.msra.mxu1 %v3157_v11  ;;  %v1772_v12 = vadd.f32 %v4010_v40, %v3896_v28 }
 0x1f2   :  { %v684_v39 = vpop.permute.xlu1 %683  ;;  %1379 = vrot.lane.b32.xlu0 %v1339_v24, %s3179_s28  ;;  %2818 = vmatprep.mubr.msk.bf16.mxu1 %vm104_vm0, %v2106_v52  ;;  %v1799_v24 = vmax.f32 %v1737_v19, 0.0  ;;  %v2046_v23 = vmax.f32 %v1998_v38, 0.0  ;;  %v2019_v52 = vadd.f32 %v4010_v40, %v3100_v56  ;;  %v410_v51 = vmax.f32 %v392_v37, 0.0 }
 0x1f3   :  { %721 = vst.msk [vmem:[#allocation2 + $0xb0] sm:$0xff] %vm709_vm2, %v684_v39  ;;  %v1343_v39 = vmax.f32 %v1317_v5, 0.0  ;;  %v623_v5 = vadd.f32 %v4010_v40, %v3646_v16 }
 0x1f4   :  { %1381 = vrot.lane.b32.xlu1 %v1340_v8, %s3179_s28  ;;  %v444_v32 = vpop.permute.xlu0 %443  ;;  %v1800_v8 = vmax.f32 %v1740_v58, 0.0  ;;  %2062 = vst.msk [vmem:[#allocation2 + $0x58] sm:$0xff] %vm104_vm0, %v2046_v23  ;;  %v2051_v11 = vmax.f32 %v2019_v52, 0.0  ;;  %v389_v58 = vadd.f32 %v4010_v40, %v3617_v46 }
 0x1f5   :  { %484 = vst.msk [vmem:[#allocation2 + $0x80] sm:$0xff] %vm475_vm1, %v444_v32  ;;  %v643_v23 = vmax.f32 %v623_v5, 0.0 }
 0x1f6   :  { %v446_v49 = vpop.permute.xlu1 %445  ;;  %1613 = vrot.lane.b32.xlu0 %v1573_v43, %s3178_s1  ;;  %v1577_v43 = vmax.f32 %v1551_v35, 0.0  ;;  %2067 = vst.msk [vmem:[#allocation2 + $0xa8] sm:$0xff] %vm104_vm0, %v2051_v11  ;;  %v409_v46 = vmax.f32 %v389_v58, 0.0  ;;  %v1780_v35 = vadd.f32 %v4010_v40, %v3894_v54 }
 0x1f7   :  { %485 = vst.msk [vmem:[#allocation2 + $0x90] sm:$0xff] %vm475_vm1, %v446_v49  ;;  %v1578_v49 = vmax.f32 %v1554_v9, 0.0 }
 0x1f8   :  { %1615 = vrot.lane.b32.xlu1 %v1574_v6, %s3178_s1  ;;  %v678_v3 = vpop.permute.xlu0 %677  ;;  %v1764_v6 = vadd.f32 %v4010_v40, %v3872_v10 }
 0x1f9   :  { %718 = vst.msk [vmem:[#allocation2 + $0x80] sm:$0xff] %vm709_vm2, %v678_v3 }
 0x1fa   :  { %v680_v15 = vpop.permute.xlu1 %679  ;;  %1835 = vrot.lane.b32.xlu0 %v1801_v30, %s3177_s13  ;;  %v2010_v30 = vpop.f32.mrb[57].mxu0  ;;  %v1806_v3 = vmax.f32 %v1764_v6, 0.0 }
 0x1fb   :  { %719 = vst.msk [vmem:[#allocation2 + $0x90] sm:$0xff] %vm709_vm2, %v680_v15  ;;  %v2011_v10 = vadd.f32 %v4010_v40, %v2010_v30  ;;  %v3101_v19 = vpop.f32.mrb[58].mxu0  ;;  %v1803_v15 = vmax.f32 %v1753_v29, 0.0  ;;  %v860_v30 = vadd.f32 %v4010_v40, %v3709_v14 }
 0x1fc   :  { %1837 = vrot.lane.b32.xlu1 %v1802_v63, %s3177_s13  ;;  %v452_v41 = vpop.permute.xlu0 %451  ;;  %v2022_v1 = vadd.f32 %v4010_v40, %v3101_v19  ;;  %v2013_v13 = vpop.f32.mrb[59].mxu0 }
 0x1fd   :  { %488 = vst.msk [vmem:[#allocation2 + $0xc0] sm:$0xff] %vm475_vm1, %v452_v41  ;;  %v2049_v2 = vmax.f32 %v2011_v10, 0.0  ;;  %v2014_v63 = vadd.f32 %v4010_v40, %v2013_v13  ;;  %v626_v41 = vadd.f32 %v4010_v40, %v3650_v20  ;;  %v3104_v20 = vpop.f32.mrb[60].mxu0  ;;  %v1808_v10 = vmax.f32 %v1772_v12, 0.0 }
 0x1fe   :  { %v454_v34 = vpop.permute.xlu1 %453  ;;  %1831 = vrot.lane.b32.xlu0 %v1799_v24, %s3177_s13  ;;  %v2052_v55 = vmax.f32 %v2022_v1, 0.0  ;;  %v878_v14 = vmax.f32 %v860_v30, 0.0  ;;  %v1325_v13 = vadd.f32 %v4010_v40, %v3807_v22 }
 0x1ff   :  { %489 = vst.msk [vmem:[#allocation2 + $0xd0] sm:$0xff] %vm475_vm1, %v454_v34  ;;  %v2050_v7 = vmax.f32 %v2014_v63, 0.0  ;;  %v1328_v63 = vadd.f32 %v4010_v40, %v3816_v45 }
 0x200   :  { %1833 = vrot.lane.b32.xlu1 %v1800_v8, %s3177_s13  ;;  %v686_v31 = vpop.permute.xlu0 %685  ;;  %2065 = vst.msk [vmem:[#allocation2 + $0x88] sm:$0xff] %vm104_vm0, %v2049_v2  ;;  %2068 = vst.msk [vmem:[#allocation2 + $0xb8] sm:$0xff] %vm104_vm0, %v2052_v55  ;;  %v644_v8 = vmax.f32 %v626_v41, 0.0 }
 0x201   :  { %722 = vst.msk [vmem:[#allocation2 + $0xc0] sm:$0xff] %vm709_vm2, %v686_v31  ;;  %v1769_v31 = vadd.f32 %v4010_v40, %v3887_v21 }
 0x202   :  { %v688_v32 = vpop.permute.xlu1 %687  ;;  %1387 = vrot.lane.b32.xlu0 %v1343_v39, %s3179_s28  ;;  %2066 = vst.msk [vmem:[#allocation2 + $0x98] sm:$0xff] %vm104_vm0, %v2050_v7  ;;  %v1809_v39 = vmax.f32 %v1777_v25, 0.0  ;;  %v1788_v7 = vadd.f32 %v4010_v40, %v3918_v4 }
 0x203   :  { %723 = vst.msk [vmem:[#allocation2 + $0xd0] sm:$0xff] %vm709_vm2, %v688_v32  ;;  %v1810_v32 = vmax.f32 %v1780_v35, 0.0  ;;  %v1807_v29 = vmax.f32 %v1769_v31, 0.0 }
 0x204   :  { %1389 = vrot.lane.b32.xlu1 %v1344_v50, %s3179_s28  ;;  %v900_v42 = vpop.permute.xlu0 %899  ;;  %v2035_v50 = vadd.f32 %v4010_v40, %v3104_v20  ;;  %v1812_v5 = vmax.f32 %v1788_v7, 0.0 }
 0x205   :  { %946 = vst.msk [vmem:[#allocation2 + $0x20] sm:$0xff] %vm943_vm3, %v900_v42 }
 0x206   :  { %v902_v53 = vpop.permute.xlu1 %901  ;;  %1621 = vrot.lane.b32.xlu0 %v1577_v43, %s3178_s1  ;;  %v2026_v43 = vpop.f32.mrb[61].mxu0  ;;  %v2055_v6 = vmax.f32 %v2035_v50, 0.0 }
 0x207   :  { %947 = vst.msk [vmem:[#allocation2 + $0x30] sm:$0xff] %vm943_vm3, %v902_v53  ;;  %v2027_v54 = vadd.f32 %v4010_v40, %v2026_v43  ;;  %v3105_v9 = vpop.f32.mrb[62].mxu0 }
 0x208   :  { %1623 = vrot.lane.b32.xlu1 %v1578_v49, %s3178_s1  ;;  %v1134_v26 = vpop.permute.xlu0 %1133  ;;  %v2038_v21 = vadd.f32 %v4010_v40, %v3105_v9  ;;  %v2029_v49 = vpop.f32.mrb[63].mxu0  ;;  %2071 = vst.msk [vmem:[#allocation2 + $0xe8] sm:$0xff] %vm104_vm0, %v2055_v6 }
 0x209   :  { %1180 = vst.msk [vmem:[#allocation2 + $0x20] sm:$0xff] %vm1177_vm4, %v1134_v26  ;;  %v2053_v53 = vmax.f32 %v2027_v54, 0.0  ;;  %v2030_v56 = vadd.f32 %v4010_v40, %v2029_v49 }
 0x20a   :  { %v1136_v59 = vpop.permute.xlu1 %1135  ;;  %1843 = vrot.lane.b32.xlu0 %v1805_v36, %s3177_s13  ;;  %v857_v36 = vadd.f32 %v4010_v40, %v3699_v0  ;;  %v2056_v28 = vmax.f32 %v2038_v21, 0.0 }
 0x20b   :  { %1181 = vst.msk [vmem:[#allocation2 + $0x30] sm:$0xff] %vm1177_vm4, %v1136_v59  ;;  %v2054_v52 = vmax.f32 %v2030_v56, 0.0  ;;  %v1094_v59 = vadd.f32 %v4010_v40, %v3746_v33  ;;  %v1785_v33 = vadd.f32 %v4010_v40, %v3908_v60  ;;  %v4543_v60 = vld [vmem:[#allocation11_spill] sm:$0xff] }
 0x20c   :  { %1845 = vrot.lane.b32.xlu1 %v1806_v3, %s3177_s13  ;;  %v896_v61 = vpop.permute.xlu0 %895  ;;  %2069 = vst.msk [vmem:[#allocation2 + $0xc8] sm:$0xff] %vm104_vm0, %v2053_v53  ;;  %2072 = vst.msk [vmem:[#allocation2 + $0xf8] sm:$0xff] %vm104_vm0, %v2056_v28  ;;  %v877_v0 = vmax.f32 %v857_v36, 0.0  ;;  %v1091_v3 = vadd.f32 %v4010_v40, %v3740_v44  ;;  %v1559_v37 = vadd.f32 %v4010_v40, %v4543_v60 }
 0x20d   :  { %944 = vst.msk [vmem:[#allocation2] sm:$0xff] %vm943_vm3, %v896_v61  ;;  %v1112_v2 = vmax.f32 %v1094_v59, 0.0  ;;  %v1346_v61 = vmax.f32 %v1328_v63, 0.0  ;;  %v1811_v55 = vmax.f32 %v1785_v33, 0.0 }
 0x20e   :  { %v898_v38 = vpop.permute.xlu1 %897  ;;  %1839 = vrot.lane.b32.xlu0 %v1803_v15, %s3177_s13  ;;  %2070 = vst.msk [vmem:[#allocation2 + $0xd8] sm:$0xff] %vm104_vm0, %v2054_v52  ;;  %v1111_v1 = vmax.f32 %v1091_v3, 0.0  ;;  %v1345_v15 = vmax.f32 %v1325_v13, 0.0  ;;  %v1579_v4 = vmax.f32 %v1559_v37, 0.0  ;;  %v2080_v13 = vld [vmem:[#allocation2 + $0x38] sm:$0xff] }
 0x20f   :  { %945 = vst.msk [vmem:[#allocation2 + $0x10] sm:$0xff] %vm943_vm3, %v898_v38  ;;  %v4544_v38 = vld [vmem:[#allocation12_spill] sm:$0xff] }
 0x210   :  { %1841 = vrot.lane.b32.xlu1 %v1804_v48, %s3177_s13  ;;  %v1130_v24 = vpop.permute.xlu0 %1129 }
 0x211   :  { %1178 = vst.msk [vmem:[#allocation2] sm:$0xff] %vm1177_vm4, %v1130_v24 }
 0x212   :  { %v1132_v57 = vpop.permute.xlu1 %1131  ;;  %455 = vrot.lane.b32.xlu0 %v409_v46, %s3183_s11  ;;  %v1562_v46 = vadd.f32 %v4010_v40, %v4544_v38 }
 0x213   :  { %1179 = vst.msk [vmem:[#allocation2 + $0x10] sm:$0xff] %vm1177_vm4, %v1132_v57 }
 0x214   :  { %457 = vrot.lane.b32.xlu1 %v410_v51, %s3183_s11  ;;  %v908_v16 = vpop.permute.xlu0 %907  ;;  %v1793_v51 = vadd.f32 %v4010_v40, %v3906_v17  ;;  %v1580_v57 = vmax.f32 %v1562_v46, 0.0 }
 0x215   :  { %950 = vst.msk [vmem:[#allocation2 + $0x60] sm:$0xff] %vm943_vm3, %v908_v16 }
 0x216   :  { %v910_v34 = vpop.permute.xlu1 %909  ;;  %689 = vrot.lane.b32.xlu0 %v643_v23, %s3182_s10  ;;  %v1796_v23 = vadd.f32 %v4010_v40, %v3916_v27  ;;  %v1813_v16 = vmax.f32 %v1793_v51, 0.0  ;;  %v2088_v51 = vld [vmem:[#allocation2 + $0x78] sm:$0xff] }
 0x217   :  { %951 = vst.msk [vmem:[#allocation2 + $0x70] sm:$0xff] %vm943_vm3, %v910_v34 }
 0x218   :  { %691 = vrot.lane.b32.xlu1 %v644_v8, %s3182_s10  ;;  %v1142_v47 = vpop.permute.xlu0 %1141  ;;  %v1814_v17 = vmax.f32 %v1796_v23, 0.0 }
 0x219   :  { %1184 = vst.msk [vmem:[#allocation2 + $0x60] sm:$0xff] %vm1177_vm4, %v1142_v47 }
 0x21a   :  { %v1144_v42 = vpop.permute.xlu1 %1143  ;;  %1851 = vrot.lane.b32.xlu0 %v1809_v39, %s3177_s13 }
 0x21b   :  { %1185 = vst.msk [vmem:[#allocation2 + $0x70] sm:$0xff] %vm1177_vm4, %v1144_v42 }
 0x21c   :  { %1853 = vrot.lane.b32.xlu1 %v1810_v32, %s3177_s13  ;;  %v904_v26 = vpop.permute.xlu0 %903 }
 0x21d   :  { %948 = vst.msk [vmem:[#allocation2 + $0x40] sm:$0xff] %vm943_vm3, %v904_v26 }
 0x21e   :  { %v906_v19 = vpop.permute.xlu1 %905  ;;  %1847 = vrot.lane.b32.xlu0 %v1807_v29, %s3177_s13 }
 0x21f   :  { %949 = vst.msk [vmem:[#allocation2 + $0x50] sm:$0xff] %vm943_vm3, %v906_v19 }
 0x220   :  { %1849 = vrot.lane.b32.xlu1 %v1808_v10, %s3177_s13  ;;  %v1138_v62 = vpop.permute.xlu0 %1137 }
 0x221   :  { %1182 = vst.msk [vmem:[#allocation2 + $0x40] sm:$0xff] %vm1177_vm4, %v1138_v62 }
 0x222   :  { %v1140_v11 = vpop.permute.xlu1 %1139  ;;  %923 = vrot.lane.b32.xlu0 %v877_v0, %s3181_s30 }
 0x223   :  { %1183 = vst.msk [vmem:[#allocation2 + $0x50] sm:$0xff] %vm1177_vm4, %v1140_v11 }
 0x224   :  { %925 = vrot.lane.b32.xlu1 %v878_v14, %s3181_s30  ;;  %v916_v44 = vpop.permute.xlu0 %915 }
 0x225   :  { %954 = vst.msk [vmem:[#allocation2 + $0xa0] sm:$0xff] %vm943_vm3, %v916_v44 }
 0x226   :  { %v918_v58 = vpop.permute.xlu1 %917  ;;  %1157 = vrot.lane.b32.xlu0 %v1111_v1, %s3180_s29  ;;  %v2078_v1 = vld [vmem:[#allocation2 + $0x28] sm:$0xff] }
 0x227   :  { %955 = vst.msk [vmem:[#allocation2 + $0xb0] sm:$0xff] %vm943_vm3, %v918_v58 }
 0x228   :  { %1159 = vrot.lane.b32.xlu1 %v1112_v2, %s3180_s29  ;;  %v1150_v22 = vpop.permute.xlu0 %1149 }
 0x229   :  { %1188 = vst.msk [vmem:[#allocation2 + $0xa0] sm:$0xff] %vm1177_vm4, %v1150_v22 }
 0x22a   :  { %v1152_v45 = vpop.permute.xlu1 %1151  ;;  %1391 = vrot.lane.b32.xlu0 %v1345_v15, %s3179_s28  ;;  %v2108_v15 = vpack.c.bf16 %v2080_v13, %v2078_v1 }
 0x22b   :  { %1189 = vst.msk [vmem:[#allocation2 + $0xb0] sm:$0xff] %vm1177_vm4, %v1152_v45 }
 0x22c   :  { %1393 = vrot.lane.b32.xlu1 %v1346_v61, %s3179_s28  ;;  %v912_v48 = vpop.permute.xlu0 %911  ;;  %v2082_v61 = vld [vmem:[#allocation2 + $0x48] sm:$0xff] }
 0x22d   :  { %952 = vst.msk [vmem:[#allocation2 + $0x80] sm:$0xff] %vm943_vm3, %v912_v48 }
 0x22e   :  { %v914_v24 = vpop.permute.xlu1 %913  ;;  %1855 = vrot.lane.b32.xlu0 %v1811_v55, %s3177_s13  ;;  %v2084_v55 = vld [vmem:[#allocation2 + $0x58] sm:$0xff] }
 0x22f   :  { %953 = vst.msk [vmem:[#allocation2 + $0x90] sm:$0xff] %vm943_vm3, %v914_v24  ;;  %v2110_v48 = vpack.c.bf16 %v2084_v55, %v2082_v61 }
 0x230   :  { %1857 = vrot.lane.b32.xlu1 %v1812_v5, %s3177_s13  ;;  %v1146_v41 = vpop.permute.xlu0 %1145 }
 0x231   :  { %1186 = vst.msk [vmem:[#allocation2 + $0x80] sm:$0xff] %vm1177_vm4, %v1146_v41 }
 0x232   :  { %v1148_v25 = vpop.permute.xlu1 %1147  ;;  %1625 = vrot.lane.b32.xlu0 %v1579_v4, %s3178_s1  ;;  %v2086_v4 = vld [vmem:[#allocation2 + $0x68] sm:$0xff] }
 0x233   :  { %1187 = vst.msk [vmem:[#allocation2 + $0x90] sm:$0xff] %vm1177_vm4, %v1148_v25 }
 0x234   :  { %1627 = vrot.lane.b32.xlu1 %v1580_v57, %s3178_s1  ;;  %v920_v8 = vpop.permute.xlu0 %919 }
 0x235   :  { %956 = vst.msk [vmem:[#allocation2 + $0xc0] sm:$0xff] %vm943_vm3, %v920_v8  ;;  %v2112_v8 = vpack.c.bf16 %v2088_v51, %v2086_v4 }
 0x236   :  { %v922_v35 = vpop.permute.xlu1 %921  ;;  %1859 = vrot.lane.b32.xlu0 %v1813_v16, %s3177_s13 }
 0x237   :  { %957 = vst.msk [vmem:[#allocation2 + $0xd0] sm:$0xff] %vm943_vm3, %v922_v35  ;;  %v2090_v35 = vld [vmem:[#allocation2 + $0x88] sm:$0xff] }
 0x238   :  { %1861 = vrot.lane.b32.xlu1 %v1814_v17, %s3177_s13  ;;  %v1154_v27 = vpop.permute.xlu0 %1153 }
 0x239   :  { %1190 = vst.msk [vmem:[#allocation2 + $0xc0] sm:$0xff] %vm1177_vm4, %v1154_v27  ;;  %v2092_v27 = vld [vmem:[#allocation2 + $0x98] sm:$0xff] }
 0x23a   :  { %v1156_v40 = vpop.permute.xlu1 %1155 }
 0x23b   :  { %1191 = vst.msk [vmem:[#allocation2 + $0xd0] sm:$0xff] %vm1177_vm4, %v1156_v40 }
 0x23c   :  { %v1368_v34 = vpop.permute.xlu0 %1367 }
 0x23d   :  { %1414 = vst.msk [vmem:[#allocation2 + $0x20] sm:$0xff] %vm1411_vm5, %v1368_v34 }
 0x23e   :  { %v1370_v20 = vpop.permute.xlu1 %1369 }
 0x23f   :  { %1415 = vst.msk [vmem:[#allocation2 + $0x30] sm:$0xff] %vm1411_vm5, %v1370_v20 }
 0x240   :  { %v1602_v39 = vpop.permute.xlu0 %1601 }
 0x241   :  { %1648 = vst.msk [vmem:[#allocation2 + $0x20] sm:$0xff] %vm1645_vm6, %v1602_v39 }
 0x242   :  { %v1604_v31 = vpop.permute.xlu1 %1603 }
 0x243   :  { %1649 = vst.msk [vmem:[#allocation2 + $0x30] sm:$0xff] %vm1645_vm6, %v1604_v31  ;;  %v2114_v31 = vpack.c.bf16 %v2092_v27, %v2090_v35 }
 0x244   :  { %v1364_v47 = vpop.permute.xlu0 %1363 }
 0x245   :  { %1412 = vst.msk [vmem:[#allocation2] sm:$0xff] %vm1411_vm5, %v1364_v47 }
 0x246   :  { %v1366_v50 = vpop.permute.xlu1 %1365 }
 0x247   :  { %1413 = vst.msk [vmem:[#allocation2 + $0x10] sm:$0xff] %vm1411_vm5, %v1366_v50 }
 0x248   :  { %v1598_v43 = vpop.permute.xlu0 %1597 }
 0x249   :  { %1646 = vst.msk [vmem:[#allocation2] sm:$0xff] %vm1645_vm6, %v1598_v43 }
 0x24a   :  { %v1600_v54 = vpop.permute.xlu1 %1599 }
 0x24b   :  { %1647 = vst.msk [vmem:[#allocation2 + $0x10] sm:$0xff] %vm1645_vm6, %v1600_v54 }
 0x24c   :  { %v1376_v9 = vpop.permute.xlu0 %1375 }
 0x24d   :  { %1418 = vst.msk [vmem:[#allocation2 + $0x60] sm:$0xff] %vm1411_vm5, %v1376_v9  ;;  %v2094_v9 = vld [vmem:[#allocation2 + $0xa8] sm:$0xff] }
 0x24e   :  { %v1378_v32 = vpop.permute.xlu1 %1377 }
 0x24f   :  { %1419 = vst.msk [vmem:[#allocation2 + $0x70] sm:$0xff] %vm1411_vm5, %v1378_v32  ;;  %v2096_v32 = vld [vmem:[#allocation2 + $0xb8] sm:$0xff] }
 0x250   :  { %v1610_v12 = vpop.permute.xlu0 %1609 }
 0x251   :  { %1652 = vst.msk [vmem:[#allocation2 + $0x60] sm:$0xff] %vm1645_vm6, %v1610_v12 }
 0x252   :  { %v1612_v42 = vpop.permute.xlu1 %1611 }
 0x253   :  { %1653 = vst.msk [vmem:[#allocation2 + $0x70] sm:$0xff] %vm1645_vm6, %v1612_v42 }
 0x254   :  { %v1372_v6 = vpop.permute.xlu0 %1371 }
 0x255   :  { %1416 = vst.msk [vmem:[#allocation2 + $0x40] sm:$0xff] %vm1411_vm5, %v1372_v6 }
 0x256   :  { %v1374_v21 = vpop.permute.xlu1 %1373 }
 0x257   :  { %1417 = vst.msk [vmem:[#allocation2 + $0x50] sm:$0xff] %vm1411_vm5, %v1374_v21 }
 0x258   :  { %v1606_v49 = vpop.permute.xlu0 %1605 }
 0x259   :  { %1650 = vst.msk [vmem:[#allocation2 + $0x40] sm:$0xff] %vm1645_vm6, %v1606_v49 }
 0x25a   :  { %v1608_v53 = vpop.permute.xlu1 %1607 }
 0x25b   :  { %1651 = vst.msk [vmem:[#allocation2 + $0x50] sm:$0xff] %vm1645_vm6, %v1608_v53  ;;  %v2116_v53 = vpack.c.bf16 %v2096_v32, %v2094_v9 }
 0x25c   :  { %v1384_v56 = vpop.permute.xlu0 %1383 }
 0x25d   :  { %1422 = vst.msk [vmem:[#allocation2 + $0xa0] sm:$0xff] %vm1411_vm5, %v1384_v56 }
 0x25e   :  { %v1386_v36 = vpop.permute.xlu1 %1385 }
 0x25f   :  { %1423 = vst.msk [vmem:[#allocation2 + $0xb0] sm:$0xff] %vm1411_vm5, %v1386_v36  ;;  %v2098_v36 = vld [vmem:[#allocation2 + $0xc8] sm:$0xff] }
 0x260   :  { %v1618_v29 = vpop.permute.xlu0 %1617 }
 0x261   :  { %1656 = vst.msk [vmem:[#allocation2 + $0xa0] sm:$0xff] %vm1645_vm6, %v1618_v29  ;;  %v2100_v29 = vld [vmem:[#allocation2 + $0xd8] sm:$0xff] }
 0x262   :  { %v1620_v26 = vpop.permute.xlu1 %1619 }
 0x263   :  { %1657 = vst.msk [vmem:[#allocation2 + $0xb0] sm:$0xff] %vm1645_vm6, %v1620_v26 }
 0x264   :  { %v1380_v28 = vpop.permute.xlu0 %1379 }
 0x265   :  { %1420 = vst.msk [vmem:[#allocation2 + $0x80] sm:$0xff] %vm1411_vm5, %v1380_v28 }
 0x266   :  { %v1382_v52 = vpop.permute.xlu1 %1381 }
 0x267   :  { %1421 = vst.msk [vmem:[#allocation2 + $0x90] sm:$0xff] %vm1411_vm5, %v1382_v52 }
 0x268   :  { %v1614_v30 = vpop.permute.xlu0 %1613 }
 0x269   :  { %1654 = vst.msk [vmem:[#allocation2 + $0x80] sm:$0xff] %vm1645_vm6, %v1614_v30 }
 0x26a   :  { %v1616_v10 = vpop.permute.xlu1 %1615 }
 0x26b   :  { %1655 = vst.msk [vmem:[#allocation2 + $0x90] sm:$0xff] %vm1645_vm6, %v1616_v10  ;;  %v2118_v10 = vpack.c.bf16 %v2100_v29, %v2098_v36 }
 0x26c   :  { %v1836_v19 = vpop.permute.xlu0 %1835 }
 0x26d   :  { %1882 = vst.msk [vmem:[#allocation2 + $0x20] sm:$0xff] %vm1879_vm7, %v1836_v19 }
 0x26e   :  { %v1838_v0 = vpop.permute.xlu1 %1837 }
 0x26f   :  { %1883 = vst.msk [vmem:[#allocation2 + $0x30] sm:$0xff] %vm1879_vm7, %v1838_v0 }
 0x270   :  { %v1832_v3 = vpop.permute.xlu0 %1831 }
 0x271   :  { %1880 = vst.msk [vmem:[#allocation2] sm:$0xff] %vm1879_vm7, %v1832_v3 }
 0x272   :  { %v1834_v62 = vpop.permute.xlu1 %1833 }
 0x273   :  { %1881 = vst.msk [vmem:[#allocation2 + $0x10] sm:$0xff] %vm1879_vm7, %v1834_v62 }
 0x274   :  { %v1388_v14 = vpop.permute.xlu0 %1387  ;;  %v2077_v37 = vld [vmem:[#allocation2 + $0x20] sm:$0xff] }
 0x275   :  { %1424 = vst.msk [vmem:[#allocation2 + $0xc0] sm:$0xff] %vm1411_vm5, %v1388_v14  ;;  %v2102_v14 = vld [vmem:[#allocation2 + $0xe8] sm:$0xff] }
 0x276   :  { %v1390_v59 = vpop.permute.xlu1 %1389  ;;  %v2079_v45 = vld [vmem:[#allocation2 + $0x30] sm:$0xff] }
 0x277   :  { %1425 = vst.msk [vmem:[#allocation2 + $0xd0] sm:$0xff] %vm1411_vm5, %v1390_v59  ;;  %v2107_v38 = vpack.c.bf16 %v2079_v45, %v2077_v37  ;;  %v2104_v59 = vld [vmem:[#allocation2 + $0xf8] sm:$0xff] }
 0x278   :  { %v1622_v11 = vpop.permute.xlu0 %1621  ;;  %v2073_v2 = vld [vmem:[#allocation2] sm:$0xff] }
 0x279   :  { %1658 = vst.msk [vmem:[#allocation2 + $0xc0] sm:$0xff] %vm1645_vm6, %v1622_v11 }
 0x27a   :  { %v1624_v44 = vpop.permute.xlu1 %1623  ;;  %v2075_v63 = vld [vmem:[#allocation2 + $0x10] sm:$0xff] }
 0x27b   :  { %1659 = vst.msk [vmem:[#allocation2 + $0xd0] sm:$0xff] %vm1645_vm6, %v1624_v44  ;;  %v2105_v33 = vpack.c.bf16 %v2075_v63, %v2073_v2  ;;  %v2120_v2 = vpack.c.bf16 %v2104_v59, %v2102_v14 }
 0x27c   :  { %v1844_v58 = vpop.permute.xlu0 %1843 }
 0x27d   :  { %1886 = vst.msk [vmem:[#allocation2 + $0x60] sm:$0xff] %vm1879_vm7, %v1844_v58  ;;  %2257 = vmatmul.mubr.bf16.vlgmr.msra.gmra.mrb[80].mxu1 %v2105_v33 }
 0x27e   :  { %v1846_v22 = vpop.permute.xlu1 %1845  ;;  %2819 = vmatprep.mubr.msk.bf16.mxu1 %vm104_vm0, %v2108_v15  ;;  %v3158_v15 = vld [vmem:[%s4519_s5] sm:$0xff]  }
 0x27f   :  { %1887 = vst.msk [vmem:[#allocation2 + $0x70] sm:$0xff] %vm1879_vm7, %v1846_v22  ;;  %3106 = vmatprep.subr.bf16.mxu0 %v3158_v15  ;;  %v4281_v22 = vld [vmem:[%s4521_s4] ss:$0 sm:$0xff] }
 0x280   :  { %v1840_v7 = vpop.permute.xlu0 %1839  ;;  %3107 = vmatpush3.bf16.msra.mxu0 %v3158_v15  ;;  %v3167_v15 = vld [vmem:[%s4520_s7 + $0x40] sm:$0xff]  }
 0x281   :  { %1884 = vst.msk [vmem:[#allocation2 + $0x40] sm:$0xff] %vm1879_vm7, %v1840_v7  ;;  %2568 = vmatprep.subr.bf16.mxu0 %v3184_v18 }
 0x282   :  { %v1842_v60 = vpop.permute.xlu1 %1841 }
 0x283   :  { %1885 = vst.msk [vmem:[#allocation2 + $0x50] sm:$0xff] %vm1879_vm7, %v1842_v60 }
 0x284   :  { %v456_v46 = vpop.permute.xlu0 %455  ;;  %v2085_v39 = vld [vmem:[#allocation2 + $0x60] sm:$0xff] }
 0x285   :  { %490 = vst.msk [vmem:[#allocation2 + $0xe0] sm:$0xff] %vm475_vm1, %v456_v46  ;;  %2265 = vmatmul.mubr.bf16.gmra.mrb[84].mxu1 %v2107_v38 }
 0x286   :  { %v458_v5 = vpop.permute.xlu1 %457  ;;  %2820 = vmatprep.mubr.msk.bf16.mxu1 %vm104_vm0, %v2110_v48  ;;  %v2087_v34 = vld [vmem:[#allocation2 + $0x70] sm:$0xff] }
 0x287   :  { %491 = vst.msk [vmem:[#allocation2 + $0xf0] sm:$0xff] %vm475_vm1, %v458_v5  ;;  %v2111_v47 = vpack.c.bf16 %v2087_v34, %v2085_v39  ;;  %v3160_v34 = vld [vmem:[%s4520_s7 + $0x8] sm:$0xff]  }
 0x288   :  { %v690_v24 = vpop.permute.xlu0 %689  ;;  %v2081_v57 = vld [vmem:[#allocation2 + $0x40] sm:$0xff] }
 0x289   :  { %724 = vst.msk [vmem:[#allocation2 + $0xe0] sm:$0xff] %vm709_vm2, %v690_v24 }
 0x28a   :  { %v692_v41 = vpop.permute.xlu1 %691  ;;  %v2083_v23 = vld [vmem:[#allocation2 + $0x50] sm:$0xff] }
 0x28b   :  { %725 = vst.msk [vmem:[#allocation2 + $0xf0] sm:$0xff] %vm709_vm2, %v692_v41  ;;  %v2109_v25 = vpack.c.bf16 %v2083_v23, %v2081_v57 }
 0x28c   :  { %v1852_v16 = vpop.permute.xlu0 %1851 }
 0x28d   :  { %1890 = vst.msk [vmem:[#allocation2 + $0xa0] sm:$0xff] %vm1879_vm7, %v1852_v16  ;;  %2273 = vmatmul.mubr.bf16.gmra.mrb[88].mxu1 %v2109_v25  ;;  %v3159_v16 = vld [vmem:[%s4520_s7] sm:$0xff]  }
 0x28e   :  { %v1854_v17 = vpop.permute.xlu1 %1853  ;;  %2821 = vmatprep.mubr.msk.bf16.mxu1 %vm104_vm0, %v2112_v8 }
 0x28f   :  { %1891 = vst.msk [vmem:[#allocation2 + $0xb0] sm:$0xff] %vm1879_vm7, %v1854_v17 }
 0x290   :  { %v1848_v40 = vpop.permute.xlu0 %1847 }
 0x291   :  { %1888 = vst.msk [vmem:[#allocation2 + $0x80] sm:$0xff] %vm1879_vm7, %v1848_v40 }
 0x292   :  { %v1850_v20 = vpop.permute.xlu1 %1849 }
 0x293   :  { %1889 = vst.msk [vmem:[#allocation2 + $0x90] sm:$0xff] %vm1879_vm7, %v1850_v20 }
 0x294   :  { %v924_v50 = vpop.permute.xlu0 %923  ;;  %v2093_v30 = vld [vmem:[#allocation2 + $0xa0] sm:$0xff] }
 0x295   :  { %958 = vst.msk [vmem:[#allocation2 + $0xe0] sm:$0xff] %vm943_vm3, %v924_v50  ;;  %2281 = vmatmul.mubr.bf16.gmra.mrb[92].mxu1 %v2111_v47  ;;  %v3161_v50 = vld [vmem:[%s4520_s7 + $0x10] sm:$0xff]  }
 0x296   :  { %v926_v43 = vpop.permute.xlu1 %925  ;;  %2822 = vmatprep.mubr.msk.bf16.mxu1 %vm104_vm0, %v2114_v31  ;;  %v2095_v28 = vld [vmem:[#allocation2 + $0xb0] sm:$0xff] }
 0x297   :  { %959 = vst.msk [vmem:[#allocation2 + $0xf0] sm:$0xff] %vm943_vm3, %v926_v43  ;;  %v2115_v19 = vpack.c.bf16 %v2095_v28, %v2093_v30  ;;  %v3164_v30 = vld [vmem:[%s4520_s7 + $0x28] sm:$0xff]  }
 0x298   :  { %v1158_v54 = vpop.permute.xlu0 %1157  ;;  %v2089_v42 = vld [vmem:[#allocation2 + $0x80] sm:$0xff] }
 0x299   :  { %1192 = vst.msk [vmem:[#allocation2 + $0xe0] sm:$0xff] %vm1177_vm4, %v1158_v54 }
 0x29a   :  { %v1160_v12 = vpop.permute.xlu1 %1159  ;;  %v2091_v6 = vld [vmem:[#allocation2 + $0x90] sm:$0xff] }
 0x29b   :  { %1193 = vst.msk [vmem:[#allocation2 + $0xf0] sm:$0xff] %vm1177_vm4, %v1160_v12  ;;  %v2113_v21 = vpack.c.bf16 %v2091_v6, %v2089_v42  ;;  %v3162_v42 = vld [vmem:[%s4520_s7 + $0x18] sm:$0xff]  }
 0x29c   :  { %v1392_v49 = vpop.permute.xlu0 %1391 }
 0x29d   :  { %1426 = vst.msk [vmem:[#allocation2 + $0xe0] sm:$0xff] %vm1411_vm5, %v1392_v49  ;;  %2289 = vmatmul.mubr.bf16.gmra.mrb[96].mxu1 %v2113_v21 }
 0x29e   :  { %v1394_v56 = vpop.permute.xlu1 %1393  ;;  %2823 = vmatprep.mubr.msk.bf16.mxu1 %vm104_vm0, %v2116_v53 }
 0x29f   :  { %1427 = vst.msk [vmem:[#allocation2 + $0xf0] sm:$0xff] %vm1411_vm5, %v1394_v56  ;;  %v3163_v56 = vld [vmem:[%s4520_s7 + $0x20] sm:$0xff]  }
 0x2a0   :  { %v1856_v26 = vpop.permute.xlu0 %1855 }
 0x2a1   :  { %1892 = vst.msk [vmem:[#allocation2 + $0xc0] sm:$0xff] %vm1879_vm7, %v1856_v26 }
 0x2a2   :  { %v1858_v52 = vpop.permute.xlu1 %1857 }
 0x2a3   :  { %1893 = vst.msk [vmem:[#allocation2 + $0xd0] sm:$0xff] %vm1879_vm7, %v1858_v52 }
 0x2a4   :  { %v1626_v0 = vpop.permute.xlu0 %1625 }
 0x2a5   :  { %1660 = vst.msk [vmem:[#allocation2 + $0xe0] sm:$0xff] %vm1645_vm6, %v1626_v0  ;;  %2297 = vmatmul.mubr.bf16.gmra.mrb[100].mxu1 %v2115_v19 }
 0x2a6   :  { %v1628_v3 = vpop.permute.xlu1 %1627  ;;  %2824 = vmatprep.mubr.msk.bf16.mxu1 %vm104_vm0, %v2118_v10 }
 0x2a7   :  { %1661 = vst.msk [vmem:[#allocation2 + $0xf0] sm:$0xff] %vm1645_vm6, %v1628_v3 }
 0x2a8   :  { %v1860_v62 = vpop.permute.xlu0 %1859  ;;  %v2097_v1 = vld [vmem:[#allocation2 + $0xc0] sm:$0xff] }
 0x2a9   :  { %1894 = vst.msk [vmem:[#allocation2 + $0xe0] sm:$0xff] %vm1879_vm7, %v1860_v62  ;;  %v3165_v62 = vld [vmem:[%s4520_s7 + $0x30] sm:$0xff]  }
 0x2aa   :  { %v1862_v11 = vpop.permute.xlu1 %1861  ;;  %v2099_v13 = vld [vmem:[#allocation2 + $0xd0] sm:$0xff] }
 0x2ab   :  { %1895 = vst.msk [vmem:[#allocation2 + $0xf0] sm:$0xff] %vm1879_vm7, %v1862_v11  ;;  %v2117_v44 = vpack.c.bf16 %v2099_v13, %v2097_v1 }
 0x2ad   :  { %2305 = vmatmul.mubr.bf16.gmra.mrb[104].mxu1 %v2117_v44  ;;  %v3166_v44 = vld [vmem:[%s4520_s7 + $0x38] sm:$0xff]  }
 0x2ae   :  { %2825 = vmatprep.mubr.msk.bf16.mxu1 %vm104_vm0, %v2120_v2 }
 0x2b0   :  { %v2101_v63 = vld [vmem:[#allocation2 + $0xe0] sm:$0xff] }
 0x2b2   :  { %v2103_v33 = vld [vmem:[#allocation2 + $0xf0] sm:$0xff] }
 0x2b3   :  { %v2119_v58 = vpack.c.bf16 %v2103_v33, %v2101_v63 }
 0x2b5   :  { %2313 = vmatmul.mubr.bf16.gmra.mrb[108].mxu1 %v2119_v58 }
 0x350   :  { %v2258_v61 = vpop.f32.mrb[80].mxu1 }
 0x351   :  { %v2259_v55 = vadd.f32 %v4281_v22, %v2258_v61  ;;  %v2260_v7 = vpop.f32.mrb[81].mxu1 }
 0x352   :  { %v2261_v45 = vpop.f32.mrb[82].mxu1 }
 0x353   :  { %v2262_v60 = vadd.f32 %v4281_v22, %v2261_v45  ;;  %v2263_v37 = vpop.f32.mrb[83].mxu1  ;;  %v2321_v48 = vmax.f32 %v2259_v55, 0.0 }
 0x355   :  { %v2322_v38 = vmax.f32 %v2262_v60, 0.0 }
 0x357   :  { %v2337_v46 = vpack.c.bf16 %v2322_v38, %v2321_v48 }
 0x358   :  { %v2266_v5 = vpop.f32.mrb[84].mxu1 }
 0x359   :  { %v2267_v24 = vadd.f32 %v4281_v22, %v2266_v5  ;;  %v2268_v4 = vpop.f32.mrb[85].mxu1  ;;  %3108 = vmatprep.mubr.msk.bf16.mxu0 %vm104_vm0, %v2337_v46 }
 0x35a   :  { %v2269_v51 = vpop.f32.mrb[86].mxu1 }
 0x35b   :  { %v2270_v41 = vadd.f32 %v4281_v22, %v2269_v51  ;;  %v2271_v57 = vpop.f32.mrb[87].mxu1  ;;  %v2323_v23 = vmax.f32 %v2267_v24, 0.0 }
 0x35d   :  { %v2324_v25 = vmax.f32 %v2270_v41, 0.0 }
 0x35f   :  { %v2338_v8 = vpack.c.bf16 %v2324_v25, %v2323_v23 }
 0x360   :  { %v2274_v17 = vpop.f32.mrb[88].mxu1 }
 0x361   :  { %v2275_v35 = vadd.f32 %v4281_v22, %v2274_v17  ;;  %v2276_v27 = vpop.f32.mrb[89].mxu1  ;;  %3109 = vmatmul.mubr.msk.bf16.vlgmr.msra.gmra.mrb[64].mxu0 %vm104_vm0, %v2338_v8  ;;  %v4545_v8 = vld [vmem:[#allocation3_spill] sm:$0xff] }
 0x362   :  { %v2277_v40 = vpop.f32.mrb[90].mxu1  ;;  %2569 = vmatpush1.bf16.msra.mxu0 %v3159_v16  ;;  %v3169_v17 = vld [vmem:[%s4515_s0] ss:$8 sps:$4 sm:$0xff]   ;;  %v4547_v27 = vld [vmem:[#allocation5_spill] sm:$0xff] }
 0x363   :  { %v2278_v20 = vadd.f32 %v4281_v22, %v2277_v40  ;;  %v2279_v39 = vpop.f32.mrb[91].mxu1  ;;  %2570 = vmatprep.subr.bf16.mxu0 %v3184_v18  ;;  %v2325_v31 = vmax.f32 %v2275_v35, 0.0  ;;  %v4546_v35 = vld [vmem:[#allocation4_spill] sm:$0xff] }
 0x364   :  { %v3171_v40 = vld [vmem:[%s4515_s0 + $0x20] ss:$8 sps:$4 sm:$0xff]  }
 0x365   :  { %v2326_v47 = vmax.f32 %v2278_v20, 0.0  ;;  %v3172_v20 = vld [vmem:[%s4515_s0 + $0x30] ss:$8 sps:$4 sm:$0xff]   ;;  %v4549_v39 = vld [vmem:[#allocation7_spill] sm:$0xff] }
 0x366   :  { %2571 = vmatpush1.bf16.msra.mxu0 %v3160_v34  ;;  %v4548_v34 = vld [vmem:[#allocation6_spill] sm:$0xff] }
 0x367   :  { %v2339_v43 = vpack.c.bf16 %v2326_v47, %v2325_v31  ;;  %2572 = vmatprep.subr.bf16.mxu0 %v3184_v18  ;;  %v3173_v31 = vld [vmem:[%s4515_s0 + $0x40] ss:$8 sps:$4 sm:$0xff]  }
 0x368   :  { %v2282_v54 = vpop.f32.mrb[92].mxu1  ;;  %v4550_v47 = vld [vmem:[#allocation8_spill] sm:$0xff] }
 0x369   :  { %v2283_v9 = vadd.f32 %v4281_v22, %v2282_v54  ;;  %v2284_v32 = vpop.f32.mrb[93].mxu1  ;;  %3112 = vmatprep.mubr.msk.bf16.mxu0 %vm104_vm0, %v2339_v43  ;;  %v4551_v43 = vld [vmem:[#allocation9_spill] sm:$0xff]  ;;  %v3175_v54 = vld [vmem:[%s4515_s0 + $0x60] ss:$8 sps:$4 sm:$0xff]  }
 0x36a   :  { %v2285_v12 = vpop.f32.mrb[94].mxu1  ;;  %2573 = vmatpush1.bf16.msra.mxu0 %v3161_v50  ;;  %v3174_v50 = vld [vmem:[%s4515_s0 + $0x50] ss:$8 sps:$4 sm:$0xff]  }
 0x36b   :  { %v2286_v6 = vadd.f32 %v4281_v22, %v2285_v12  ;;  %v2287_v21 = vpop.f32.mrb[95].mxu1  ;;  %2574 = vmatprep.subr.bf16.mxu0 %v3184_v18  ;;  %v2327_v49 = vmax.f32 %v2283_v9, 0.0  ;;  %v4552_v9 = vld [vmem:[#allocation10_spill] sm:$0xff] }
 0x36c   :  { %v3176_v32 = vld [vmem:[%s4515_s0 + $0x70] ss:$8 sps:$4 sm:$0xff]  }
 0x36d   :  { %v2328_v53 = vmax.f32 %v2286_v6, 0.0 }
 0x36e   :  { %2575 = vmatpush1.bf16.msra.mxu0 %v3162_v42 }
 0x36f   :  { %v2340_v36 = vpack.c.bf16 %v2328_v53, %v2327_v49  ;;  %2576 = vmatprep.subr.bf16.mxu0 %v3184_v18 }
 0x370   :  { %v2290_v29 = vpop.f32.mrb[96].mxu1 }
 0x371   :  { %v2291_v26 = vadd.f32 %v4281_v22, %v2290_v29  ;;  %v2292_v28 = vpop.f32.mrb[97].mxu1  ;;  %3113 = vmatmul.mubr.msk.bf16.gmra.mrb[68].mxu0 %vm104_vm0, %v2340_v36 }
 0x372   :  { %v2293_v52 = vpop.f32.mrb[98].mxu1  ;;  %2577 = vmatpush1.bf16.msra.mxu0 %v3163_v56 }
 0x373   :  { %v2294_v10 = vadd.f32 %v4281_v22, %v2293_v52  ;;  %v2295_v19 = vpop.f32.mrb[99].mxu1  ;;  %2578 = vmatprep.subr.bf16.mxu0 %v3184_v18  ;;  %v2329_v0 = vmax.f32 %v2291_v26, 0.0 }
 0x375   :  { %v2330_v3 = vmax.f32 %v2294_v10, 0.0 }
 0x376   :  { %2579 = vmatpush1.bf16.msra.mxu0 %v3164_v30 }
 0x377   :  { %v2341_v14 = vpack.c.bf16 %v2330_v3, %v2329_v0  ;;  %2580 = vmatprep.subr.bf16.mxu0 %v3184_v18  ;;  %v4403_v3 = vld [vmem:[%s4522_s6] ss:$0 sm:$0xff] }
 0x378   :  { %v2298_v59 = vpop.f32.mrb[100].mxu1 }
 0x379   :  { %v2299_v11 = vadd.f32 %v4281_v22, %v2298_v59  ;;  %v2300_v1 = vpop.f32.mrb[101].mxu1  ;;  %3116 = vmatprep.mubr.msk.bf16.mxu0 %vm104_vm0, %v2341_v14 }
 0x37a   :  { %v2301_v13 = vpop.f32.mrb[102].mxu1  ;;  %2581 = vmatpush1.bf16.msra.mxu0 %v3165_v62  ;;  %v4408_v62 = vld [vmem:[%s4523_s8] ss:$0 sm:$0xff] }
 0x37b   :  { %v2302_v2 = vadd.f32 %v4281_v22, %v2301_v13  ;;  %v2303_v63 = vpop.f32.mrb[103].mxu1  ;;  %2582 = vmatprep.subr.bf16.mxu0 %v3184_v18  ;;  %v2331_v33 = vmax.f32 %v2299_v11, 0.0 }
 0x37d   :  { %v2332_v58 = vmax.f32 %v2302_v2, 0.0 }
 0x37e   :  { %2583 = vmatpush1.bf16.msra.mxu0 %v3166_v44 }
 0x37f   :  { %v2342_v61 = vpack.c.bf16 %v2332_v58, %v2331_v33  ;;  %2584 = vmatprep.subr.bf16.mxu0 %v3184_v18 }
 0x380   :  { %v2306_v55 = vpop.f32.mrb[104].mxu1 }
 0x381   :  { %v2307_v7 = vadd.f32 %v4281_v22, %v2306_v55  ;;  %v2308_v45 = vpop.f32.mrb[105].mxu1  ;;  %3117 = vmatmul.mubr.msk.bf16.gmra.mrb[72].mxu0 %vm104_vm0, %v2342_v61 }
 0x382   :  { %v2309_v60 = vpop.f32.mrb[106].mxu1  ;;  %2585 = vmatpush1.bf16.msra.mxu0 %v3167_v15 }
 0x383   :  { %v2310_v37 = vadd.f32 %v4281_v22, %v2309_v60  ;;  %v2311_v48 = vpop.f32.mrb[107].mxu1  ;;  %v2333_v38 = vmax.f32 %v2307_v7, 0.0 }
 0x385   :  { %v2334_v46 = vmax.f32 %v2310_v37, 0.0 }
 0x387   :  { %v2343_v5 = vpack.c.bf16 %v2334_v46, %v2333_v38 }
 0x388   :  { %v2314_v24 = vpop.f32.mrb[108].mxu1 }
 0x389   :  { %v2315_v4 = vadd.f32 %v4281_v22, %v2314_v24  ;;  %v2316_v51 = vpop.f32.mrb[109].mxu1  ;;  %3120 = vmatprep.mubr.msk.bf16.mxu0 %vm104_vm0, %v2343_v5 }
 0x38a   :  { %v2317_v18 = vpop.f32.mrb[110].mxu1 }
 0x38b   :  { %v2318_v41 = vadd.f32 %v4281_v22, %v2317_v18  ;;  %v2319_v57 = vpop.f32.mrb[111].mxu1  ;;  %v2335_v23 = vmax.f32 %v2315_v4, 0.0  ;;  %v3170_v22 = vld [vmem:[%s4515_s0 + $0x10] ss:$8 sps:$4 sm:$0xff]  }
 0x38d   :  { %v2336_v25 = vmax.f32 %v2318_v41, 0.0 }
 0x38f   :  { %v2344_v16 = vpack.c.bf16 %v2336_v25, %v2335_v23 }
 0x391   :  { %3121 = vmatmul.mubr.msk.bf16.gmra.mrb[76].mxu0 %vm104_vm0, %v2344_v16 }
 0x392   :  { %2846 = vmatprep.mubr.msk.bf16.mxu0 %vm104_vm0, %v4545_v8 }
 0x399   :  { %2601 = vmatmul.mubr.bf16.vlgmr.msra.gmra.mrb[80].mxu0 %v3169_v17 }
 0x39a   :  { %2847 = vmatprep.mubr.msk.bf16.mxu0 %vm104_vm0, %v4546_v35 }
 0x3a1   :  { %2609 = vmatmul.mubr.bf16.gmra.mrb[84].mxu0 %v3170_v22 }
 0x3a2   :  { %2848 = vmatprep.mubr.msk.bf16.mxu0 %vm104_vm0, %v4547_v27 }
 0x3a9   :  { %2617 = vmatmul.mubr.bf16.gmra.mrb[88].mxu0 %v3171_v40 }
 0x3aa   :  { %2849 = vmatprep.mubr.msk.bf16.mxu0 %vm104_vm0, %v4548_v34 }
 0x3b1   :  { %2625 = vmatmul.mubr.bf16.gmra.mrb[92].mxu0 %v3172_v20 }
 0x3b2   :  { %2850 = vmatprep.mubr.msk.bf16.mxu0 %vm104_vm0, %v4549_v39 }
 0x3b9   :  { %2633 = vmatmul.mubr.bf16.gmra.mrb[96].mxu0 %v3173_v31 }
 0x3ba   :  { %2851 = vmatprep.mubr.msk.bf16.mxu0 %vm104_vm0, %v4550_v47 }
 0x3c1   :  { %2641 = vmatmul.mubr.bf16.gmra.mrb[100].mxu0 %v3174_v50 }
 0x3c2   :  { %2852 = vmatprep.mubr.msk.bf16.mxu0 %vm104_vm0, %v4551_v43 }
 0x3c9   :  { %2649 = vmatmul.mubr.bf16.gmra.mrb[104].mxu0 %v3175_v54 }
 0x3ca   :  { %2853 = vmatprep.mubr.msk.bf16.mxu0 %vm104_vm0, %v4552_v9 }
 0x3d1   :  { %2657 = vmatmul.mubr.bf16.gmra.mrb[108].mxu0 %v3176_v32 }
 0x434   :  { %v3110_v12 = vpop.f32.mrb[64].mxu0 }
 0x435   :  { %v2418_v42 = vpop.f32.mrb[65].mxu0  ;;  %v2427_v7 = vadd.f32 %v3110_v12, %v4403_v3 }
 0x436   :  { %v3111_v6 = vpop.f32.mrb[66].mxu0  ;;  %v2419_v59 = vadd.f32 %v4403_v3, %v2418_v42 }
 0x437   :  { %v2421_v21 = vpop.f32.mrb[67].mxu0  ;;  %v2430_v48 = vadd.f32 %v3111_v6, %v4403_v3 }
 0x438   :  { %v2422_v44 = vadd.f32 %v4403_v3, %v2421_v21 }
 0x444   :  { %v3114_v49 = vpop.f32.mrb[68].mxu0 }
 0x445   :  { %v2434_v53 = vpop.f32.mrb[69].mxu0  ;;  %v2443_v20 = vadd.f32 %v3114_v49, %v4403_v3 }
 0x446   :  { %v4382_v56 = vpop.f32.mrb[70].mxu0  ;;  %v2435_v41 = vadd.f32 %v4403_v3, %v2434_v53 }
 0x447   :  { %v2437_v36 = vpop.f32.mrb[71].mxu0  ;;  %v2446_v50 = vadd.f32 %v4382_v56, %v4403_v3 }
 0x448   :  { %v2438_v16 = vadd.f32 %v4403_v3, %v2437_v36 }
 0x454   :  { %v4384_v29 = vpop.f32.mrb[72].mxu0 }
 0x455   :  { %v4386_v26 = vpop.f32.mrb[73].mxu0 }
 0x456   :  { %v4388_v28 = vpop.f32.mrb[74].mxu0  ;;  %v2451_v21 = vadd.f32 %v4403_v3, %v4386_v26 }
 0x457   :  { %v4390_v52 = vpop.f32.mrb[75].mxu0 }
 0x458   :  { %v2454_v36 = vadd.f32 %v4403_v3, %v4390_v52 }
 0x464   :  { %v4392_v30 = vpop.f32.mrb[76].mxu0 }
 0x465   :  { %v4394_v10 = vpop.f32.mrb[77].mxu0 }
 0x466   :  { %v4396_v19 = vpop.f32.mrb[78].mxu0 }
 0x467   :  { %v4398_v0 = vpop.f32.mrb[79].mxu0 }
 0x46c   :  { %v2602_v14 = vpop.f32.mrb[80].mxu0 }
 0x46d   :  { %v2603_v11 = vadd.f32 %v4408_v62, %v2602_v14  ;;  %v2604_v1 = vpop.f32.mrb[81].mxu0 }
 0x46e   :  { %v2605_v13 = vpop.f32.mrb[82].mxu0 }
 0x46f   :  { %v2665_v2 = vadd.f32 %v2603_v11, %v2419_v59  ;;  %v2606_v63 = vadd.f32 %v4408_v62, %v2605_v13  ;;  %v2607_v33 = vpop.f32.mrb[83].mxu0 }
 0x471   :  { %v2681_v58 = vmax.f32 %v2665_v2, 0.0  ;;  %v2666_v15 = vadd.f32 %v2606_v63, %v2422_v44  ;;  %v2459_v2 = vadd.f32 %v4384_v29, %v4403_v3 }
 0x473   :  { %2698 = vst.msk [vmem:[%s4524_s9] sm:$0xff] %vm2697_vm8, %v2681_v58  ;;  %v2682_v61 = vmax.f32 %v2666_v15, 0.0  ;;  %v2462_v58 = vadd.f32 %v4388_v28, %v4403_v3 }
 0x474   :  { %v2610_v55 = vpop.f32.mrb[84].mxu0 }
 0x475   :  { %2699 = vst.msk [vmem:[%s4524_s9 + $0x8] sm:$0xff] %vm2697_vm8, %v2682_v61  ;;  %v2611_v45 = vadd.f32 %v4408_v62, %v2610_v55  ;;  %v2612_v60 = vpop.f32.mrb[85].mxu0 }
 0x476   :  { %v2613_v37 = vpop.f32.mrb[86].mxu0 }
 0x477   :  { %v2667_v38 = vadd.f32 %v2611_v45, %v2427_v7  ;;  %v2614_v46 = vadd.f32 %v4408_v62, %v2613_v37  ;;  %v2615_v5 = vpop.f32.mrb[87].mxu0  ;;  %v2467_v37 = vadd.f32 %v4403_v3, %v4394_v10 }
 0x479   :  { %v2683_v24 = vmax.f32 %v2667_v38, 0.0  ;;  %v2668_v4 = vadd.f32 %v2614_v46, %v2430_v48  ;;  %v2470_v46 = vadd.f32 %v4403_v3, %v4398_v0 }
 0x47b   :  { %2700 = vst.msk [vmem:[%s4524_s9 + $0x10] sm:$0xff] %vm2697_vm8, %v2683_v24  ;;  %v2684_v51 = vmax.f32 %v2668_v4, 0.0 }
 0x47c   :  { %v2618_v18 = vpop.f32.mrb[88].mxu0 }
 0x47d   :  { %2701 = vst.msk [vmem:[%s4524_s9 + $0x18] sm:$0xff] %vm2697_vm8, %v2684_v51  ;;  %v2619_v57 = vadd.f32 %v4408_v62, %v2618_v18  ;;  %v2620_v23 = vpop.f32.mrb[89].mxu0 }
 0x47e   :  { %v2621_v25 = vpop.f32.mrb[90].mxu0 }
 0x47f   :  { %v2669_v8 = vadd.f32 %v2619_v57, %v2435_v41  ;;  %v2622_v17 = vadd.f32 %v4408_v62, %v2621_v25  ;;  %v2623_v35 = vpop.f32.mrb[91].mxu0  ;;  %v2475_v57 = vadd.f32 %v4392_v30, %v4403_v3 }
 0x481   :  { %v2685_v22 = vmax.f32 %v2669_v8, 0.0  ;;  %v2670_v27 = vadd.f32 %v2622_v17, %v2438_v16  ;;  %v2478_v16 = vadd.f32 %v4396_v19, %v4403_v3 }
 0x483   :  { %2702 = vst.msk [vmem:[%s4524_s9 + $0x20] sm:$0xff] %vm2697_vm8, %v2685_v22  ;;  %v2686_v40 = vmax.f32 %v2670_v27, 0.0 }
 0x484   :  { %v2626_v34 = vpop.f32.mrb[92].mxu0 }
 0x485   :  { %2703 = vst.msk [vmem:[%s4524_s9 + $0x28] sm:$0xff] %vm2697_vm8, %v2686_v40  ;;  %v2627_v39 = vadd.f32 %v4408_v62, %v2626_v34  ;;  %v2628_v31 = vpop.f32.mrb[93].mxu0 }
 0x486   :  { %v2629_v47 = vpop.f32.mrb[94].mxu0 }
 0x487   :  { %v2671_v43 = vadd.f32 %v2627_v39, %v2443_v20  ;;  %v2630_v54 = vadd.f32 %v4408_v62, %v2629_v47  ;;  %v2631_v9 = vpop.f32.mrb[95].mxu0 }
 0x489   :  { %v2687_v32 = vmax.f32 %v2671_v43, 0.0  ;;  %v2672_v12 = vadd.f32 %v2630_v54, %v2446_v50 }
 0x48b   :  { %2704 = vst.msk [vmem:[%s4524_s9 + $0x30] sm:$0xff] %vm2697_vm8, %v2687_v32  ;;  %v2688_v42 = vmax.f32 %v2672_v12, 0.0 }
 0x48c   :  { %v2634_v6 = vpop.f32.mrb[96].mxu0 }
 0x48d   :  { %2705 = vst.msk [vmem:[%s4524_s9 + $0x38] sm:$0xff] %vm2697_vm8, %v2688_v42  ;;  %v2635_v49 = vadd.f32 %v4408_v62, %v2634_v6  ;;  %v2636_v53 = vpop.f32.mrb[97].mxu0 }
 0x48e   :  { %v2637_v56 = vpop.f32.mrb[98].mxu0 }
 0x48f   :  { %v2673_v14 = vadd.f32 %v2635_v49, %v2451_v21  ;;  %v2638_v59 = vadd.f32 %v4408_v62, %v2637_v56  ;;  %v2639_v11 = vpop.f32.mrb[99].mxu0 }
 0x491   :  { %v2689_v1 = vmax.f32 %v2673_v14, 0.0  ;;  %v2674_v13 = vadd.f32 %v2638_v59, %v2454_v36 }
 0x493   :  { %2706 = vst.msk [vmem:[%s4524_s9 + $0x40] sm:$0xff] %vm2697_vm8, %v2689_v1  ;;  %v2690_v26 = vmax.f32 %v2674_v13, 0.0 }
 0x494   :  { %v2642_v44 = vpop.f32.mrb[100].mxu0 }
 0x495   :  { %2707 = vst.msk [vmem:[%s4524_s9 + $0x48] sm:$0xff] %vm2697_vm8, %v2690_v26  ;;  %v2643_v52 = vadd.f32 %v4408_v62, %v2642_v44  ;;  %v2644_v63 = vpop.f32.mrb[101].mxu0 }
 0x496   :  { %v2645_v33 = vpop.f32.mrb[102].mxu0 }
 0x497   :  { %v2675_v15 = vadd.f32 %v2643_v52, %v2459_v2  ;;  %v2646_v61 = vadd.f32 %v4408_v62, %v2645_v33  ;;  %v2647_v55 = vpop.f32.mrb[103].mxu0 }
 0x499   :  { %v2691_v7 = vmax.f32 %v2675_v15, 0.0  ;;  %v2676_v45 = vadd.f32 %v2646_v61, %v2462_v58 }
 0x49b   :  { %2708 = vst.msk [vmem:[%s4524_s9 + $0x50] sm:$0xff] %vm2697_vm8, %v2691_v7  ;;  %v2692_v29 = vmax.f32 %v2676_v45, 0.0 }
 0x49c   :  { %v2650_v60 = vpop.f32.mrb[104].mxu0 }
 0x49d   :  { %2709 = vst.msk [vmem:[%s4524_s9 + $0x58] sm:$0xff] %vm2697_vm8, %v2692_v29  ;;  %v2651_v28 = vadd.f32 %v4408_v62, %v2650_v60  ;;  %v2652_v48 = vpop.f32.mrb[105].mxu0 }
 0x49e   :  { %v2653_v38 = vpop.f32.mrb[106].mxu0 }
 0x49f   :  { %v2677_v5 = vadd.f32 %v2651_v28, %v2467_v37  ;;  %v2654_v24 = vadd.f32 %v4408_v62, %v2653_v38  ;;  %v2655_v4 = vpop.f32.mrb[107].mxu0 }
 0x4a1   :  { %v2693_v51 = vmax.f32 %v2677_v5, 0.0  ;;  %v2678_v18 = vadd.f32 %v2654_v24, %v2470_v46 }
 0x4a3   :  { %2710 = vst.msk [vmem:[%s4524_s9 + $0x60] sm:$0xff] %vm2697_vm8, %v2693_v51  ;;  %v2694_v10 = vmax.f32 %v2678_v18, 0.0 }
 0x4a4   :  { %v2658_v41 = vpop.f32.mrb[108].mxu0 }
 0x4a5   :  { %2711 = vst.msk [vmem:[%s4524_s9 + $0x68] sm:$0xff] %vm2697_vm8, %v2694_v10  ;;  %v2659_v0 = vadd.f32 %v4408_v62, %v2658_v41  ;;  %v2660_v23 = vpop.f32.mrb[109].mxu0 }
 0x4a6   :  { %v2661_v25 = vpop.f32.mrb[110].mxu0 }
 0x4a7   :  { %v2679_v8 = vadd.f32 %v2659_v0, %v2475_v57  ;;  %v2662_v17 = vadd.f32 %v4408_v62, %v2661_v25  ;;  %v2663_v35 = vpop.f32.mrb[111].mxu0 }
 0x4a9   :  { %v2695_v22 = vmax.f32 %v2679_v8, 0.0  ;;  %v2680_v27 = vadd.f32 %v2662_v17, %v2478_v16 }
 0x4ab   :  { %2712 = vst.msk [vmem:[%s4524_s9 + $0x70] sm:$0xff] %vm2697_vm8, %v2695_v22  ;;  %v2696_v30 = vmax.f32 %v2680_v27, 0.0 }
 0x4ad   :  { %2713 = vst.msk [vmem:[%s4524_s9 + $0x78] sm:$0xff] %vm2697_vm8, %v2696_v30 }

</bundles_post_ra>
